<compile_context>
chip_gen: v7x
topology: tpu7x:2x2x1
jax: 0.10.0
libtpu: 0.0.40
codegen_flags: <defaults>
</compile_context>

<pallas_src>
import functools

import jax
import jax.numpy as jnp
from jax import lax
from jax.experimental import pallas as pl
from jax.experimental.pallas import tpu as pltpu


def _pick_block(dim, targets):
    """Largest target that evenly divides `dim`; else the full dim (always legal)."""
    for t in targets:
        if dim >= t and dim % t == 0:
            return t
    return dim


def _round_up(x, m):
    return ((x + m - 1) // m) * m


def _default_chunk(L):
    # Prefer big chunks (MXU fill, fewer grid steps); multiples of 16 keep bf16
    # sublane tiling happy.  Fall back to a padded 128/16 chunk for awkward L.
    for t in (256, 128, 64, 32, 16):
        if L % t == 0:
            return t
    return min(128, _round_up(L, 16))


def _auto_head_groups(n_head, d_head, bsz):
    # Split heads onto a second parallel grid axis only when the batch axis is too
    # small to feed both TensorCores (v7x megacore); groups must stay lane-dense.
    if bsz >= 2 or n_head < 2:
        return 1
    if n_head % 2 == 0 and ((n_head // 2) * d_head) % 128 == 0:
        return 2
    return 1


# -----------------------------------------------------------------------------
# Fast-weight (sum update) causal linear attention with fused qkv projection.
#
# grid = (bsz, head_groups, num_chunks); per-(batch, group) fast-weight state
#   S_h = sum_t phi(k_t) v_t^T   (D x D per head)
#   z_h = sum_t phi(k_t)         (1 x D per head)
# carried across the (arbitrary) chunk axis in VMEM scratch.  Each step does one
# (T, d_model)x(d_model, 3*gw) projection plus per-head (T,D)x(D,T), (T,T)x(T,D),
# (T,D)x(D,D), (D,T)x(T,D) MXU matmuls (bf16 in, f32 acc) and one lane-dense
# (T, gw) bf16 store.
# -----------------------------------------------------------------------------
def _fast_weight_kernel(h_ref, w_ref, o_ref, s_ref, z_ref, o_acc, *,
                        gh, d_head, scale, eps, normalize):
    T = h_ref.shape[0]
    D = d_head
    gw = gh * D

    @pl.when(pl.program_id(2) == 0)   # new (batch, head-group) -> reset state
    def _():
        s_ref[...] = jnp.zeros_like(s_ref)
        z_ref[...] = jnp.zeros_like(z_ref)

    # fused q/k/v projection for this chunk & head group (bf16 MXU, f32 acc)
    qkv = jnp.dot(h_ref[...].astype(jnp.bfloat16), w_ref[...],
                  preferred_element_type=jnp.float32)            # (T, 3*gw) f32

    q_all = qkv[:, 0:gw]
    k_all = qkv[:, gw:2 * gw]
    v_all = qkv[:, 2 * gw:3 * gw]

    # phi(x) = elu(x) + 1, computed lane-densely over the whole head group
    qf_all = jnp.where(q_all > 0, q_all + 1.0, jnp.exp(q_all))
    kf_all = jnp.where(k_all > 0, k_all + 1.0, jnp.exp(k_all))

    # inclusive causal mask: position t attends to s <= t
    row = lax.broadcasted_iota(jnp.int32, (T, T), 0)
    col = lax.broadcasted_iota(jnp.int32, (T, T), 1)
    causal = col <= row

    for hh in range(gh):               # static unroll over heads in this group
        sl = slice(hh * D, (hh + 1) * D)
        qf = qf_all[:, sl]
        kf = kf_all[:, sl]
        vh = v_all[:, sl]

        # sum-normalize over the head dim (f32)
        qf = qf / jnp.sum(qf, axis=-1, keepdims=True)
        kf = kf / jnp.sum(kf, axis=-1, keepdims=True)

        qf_b = qf.astype(jnp.bfloat16)
        kf_b = kf.astype(jnp.bfloat16)
        vh_b = vh.astype(jnp.bfloat16)

        s_prev = s_ref[hh]             # (D, D) f32
        z_prev = z_ref[hh]             # (1, D) f32

        scores = jnp.einsum("td,sd->ts", qf_b, kf_b,
                            preferred_element_type=jnp.float32)          # (T, T)
        scores = jnp.where(causal, scores, 0.0)
        intra = jnp.dot(scores.astype(jnp.bfloat16), vh_b,
                        preferred_element_type=jnp.float32)              # (T, D)
        inter = jnp.dot(qf_b, s_prev.astype(jnp.bfloat16),
                        preferred_element_type=jnp.float32)              # (T, D)
        num = intra + inter

        if normalize:
            denom = (jnp.sum(scores, axis=-1, keepdims=True)
                     + jnp.sum(qf * z_prev, axis=-1, keepdims=True))      # (T, 1)
            o_acc[:, sl] = scale * num / (denom + eps)
        else:
            o_acc[:, sl] = scale * num

        # fold this chunk into the carried fast-weight state (f32 accumulation)
        s_ref[hh] = s_prev + jnp.einsum("td,te->de", kf_b, vh_b,
                                        preferred_element_type=jnp.float32)
        z_ref[hh] = z_prev + jnp.sum(kf, axis=0, keepdims=True)

    # single lane-dense (T, gw) store, bf16
    o_ref[...] = o_acc[...].astype(o_ref.dtype)


def fast_weight_sum_linear_attention(h_bt, w_grouped, n_head, d_head, *, chunk,
                                     scale, eps, normalize=True):
    B, L, d_model = h_bt.shape
    G = w_grouped.shape[0]
    gh = n_head // G
    gw = gh * d_head
    HD = n_head * d_head
    assert chunk % 16 == 0 and L % chunk == 0
    if G > 1:
        assert gw % 128 == 0, "head-group width must be a multiple of 128 lanes"
    num_chunks = L // chunk

    kernel = functools.partial(_fast_weight_kernel, gh=gh, d_head=d_head,
                               scale=scale, eps=eps, normalize=normalize)

    return pl.pallas_call(
        kernel,
        grid=(B, G, num_chunks),
        in_specs=[
            pl.BlockSpec((None, chunk, d_model), lambda b, g, c: (b, c, 0)),
            pl.BlockSpec((None, d_model, 3 * gw), lambda b, g, c: (g, 0, 0)),
        ],
        out_specs=pl.BlockSpec((None, chunk, gw), lambda b, g, c: (b, c, g)),
        out_shape=jax.ShapeDtypeStruct((B, L, HD), jnp.bfloat16),
        scratch_shapes=[
            pltpu.VMEM((gh, d_head, d_head), jnp.float32),   # S per head
            pltpu.VMEM((gh, 1, d_head), jnp.float32),        # z per head
            pltpu.VMEM((chunk, gw), jnp.float32),            # per-chunk output acc
        ],
        compiler_params=pltpu.CompilerParams(
            dimension_semantics=("parallel", "parallel", "arbitrary")),
    )(h_bt, w_grouped)


# -----------------------------------------------------------------------------
# Fused o-projection + residual add + LayerNorm.
# grid = (rows, HD reduction); f32 accumulator, LN epilogue on the last k step.
# -----------------------------------------------------------------------------
def _oproj_ln_kernel(x_ref, w_ref, h_ref, g_ref, b_ref, o_ref, acc_ref, *, eps):
    @pl.when(pl.program_id(1) == 0)
    def _():
        acc_ref[...] = jnp.zeros_like(acc_ref)

    acc_ref[...] += jnp.dot(x_ref[...], w_ref[...],
                            preferred_element_type=jnp.float32)

    @pl.when(pl.program_id(1) == pl.num_programs(1) - 1)
    def _():
        x = h_ref[...] + acc_ref[...]
        mu = jnp.mean(x, axis=-1, keepdims=True)
        var = jnp.mean((x - mu) ** 2, axis=-1, keepdims=True)
        y = (x - mu) * lax.rsqrt(var + eps)
        o_ref[...] = (y * g_ref[...] + b_ref[...]).astype(o_ref.dtype)


def pallas_oproj_residual_layernorm(layer_out, w_o_t, h_flat, gamma, beta, eps=1e-5):
    M, HD = layer_out.shape
    HD2, d_model = w_o_t.shape
    assert HD == HD2 and h_flat.shape == (M, d_model)

    # VMEM-aware row-tile pick (acc + x/h/out blocks, double-buffered) so the same
    # choice also fits v7x's smaller scoped budget.
    budget = 20 * 1024 * 1024
    max_tm = max(16, budget // (6 * 4 * d_model))
    targets = tuple(t for t in (512, 256, 128, 64, 32, 16) if t <= max_tm) or (16,)
    tm = _pick_block(M, targets)
    tk = HD if HD <= 512 else _pick_block(HD, (512, 256, 128))

    return pl.pallas_call(
        functools.partial(_oproj_ln_kernel, eps=eps),
        grid=(M // tm, HD // tk),
        in_specs=[
            pl.BlockSpec((tm, tk), lambda i, k: (i, k)),          # layer_out (bf16)
            pl.BlockSpec((tk, d_model), lambda i, k: (k, 0)),     # w_o (bf16)
            pl.BlockSpec((tm, d_model), lambda i, k: (i, 0)),     # residual h (f32)
            pl.BlockSpec((1, d_model), lambda i, k: (0, 0)),      # gamma
            pl.BlockSpec((1, d_model), lambda i, k: (0, 0)),      # beta
        ],
        out_specs=pl.BlockSpec((tm, d_model), lambda i, k: (i, 0)),
        out_shape=jax.ShapeDtypeStruct((M, d_model), jnp.float32),
        scratch_shapes=[pltpu.VMEM((tm, d_model), jnp.float32)],
        compiler_params=pltpu.CompilerParams(
            dimension_semantics=("parallel", "arbitrary")),
    )(layer_out, w_o_t, h_flat, gamma, beta)


# -----------------------------------------------------------------------------
# Full layer forward.
# -----------------------------------------------------------------------------
def cuda_fast_weight_sum_linear_transformer_layer(h, params, *, n_head, d_head,
                                                  chunk=None, head_groups=None,
                                                  eps=1e-5):
    # TODO(synk): pre_lnorm=True branch, mems / carry_over_fast_weight state carry,
    # and train-mode dropout are not implemented (eval-mode defaults only).
    slen, bsz, d_model = h.shape
    HD = n_head * d_head
    scale = 1.0 / (d_head ** 0.5)

    if chunk is None:
        chunk = _default_chunk(slen)
    assert chunk % 16 == 0
    L_pad = _round_up(slen, chunk)

    G = head_groups if head_groups is not None else _auto_head_groups(n_head, d_head, bsz)
    assert n_head % G == 0
    gw = (n_head // G) * d_head

    # head-group-packed fused qkv weight: (G, d_model, 3*gw), bf16 (stays VMEM-resident)
    wq_t, wk_t, wv_t = params["w_q_t"], params["w_k_t"], params["w_v_t"]
    w_grouped = jnp.stack([
        jnp.concatenate([wq_t[:, g * gw:(g + 1) * gw],
                         wk_t[:, g * gw:(g + 1) * gw],
                         wv_t[:, g * gw:(g + 1) * gw]], axis=-1)
        for g in range(G)], axis=0)

    # one transpose to batch-major; pad the sequence up to a chunk multiple
    # (padded timesteps are appended after the real ones, so causality keeps them
    #  from affecting real outputs; they are sliced off at the end)
    h_bt = jnp.transpose(h, (1, 0, 2))                  # (bsz, slen, d_model)
    if L_pad != slen:
        h_bt = jnp.pad(h_bt, ((0, 0), (0, L_pad - slen), (0, 0)))

    layer_out = fast_weight_sum_linear_attention(
        h_bt, w_grouped, n_head, d_head, chunk=chunk, scale=scale, eps=eps)

    out = pallas_oproj_residual_layernorm(
        layer_out.reshape(bsz * L_pad, HD),
        params["w_o_t"],
        h_bt.reshape(bsz * L_pad, d_model),
        params["ln_g"], params["ln_b"], eps=eps)

    out = out.reshape(bsz, L_pad, d_model)[:, :slen, :]
    return jnp.transpose(out, (1, 0, 2))                # (slen, bsz, d_model)


# -----------------------------------------------------------------------------
# Pure-JAX reference mirroring the PyTorch forward, for correctness checking.
# -----------------------------------------------------------------------------
def reference_forward(h, w_q, w_k, w_v, w_o, ln_g, ln_b, n_head, d_head, eps=1e-5):
    HIGH = lax.Precision.HIGHEST
    slen, bsz, d_model = h.shape

    def proj(w):
        return jnp.einsum("lbm,nm->lbn", h, w, precision=HIGH).reshape(
            slen, bsz, n_head, d_head)

    perm = lambda t: jnp.transpose(t, (1, 2, 0, 3))     # (B, H, L, D)
    hq, hk, hv = perm(proj(w_q)), perm(proj(w_k)), perm(proj(w_v))

    elu1 = lambda x: jnp.where(x > 0, x + 1.0, jnp.exp(x))
    hq = elu1(hq)
    hk = elu1(hk)
    hq = hq / jnp.sum(hq, axis=-1, keepdims=True)
    hk = hk / jnp.sum(hk, axis=-1, keepdims=True)

    denom_acc = jnp.cumsum(hk, axis=2)
    denominator = jnp.einsum("bhld,bhld->bhl", denom_acc, hq,
                             precision=HIGH)[..., None]

    kv = jnp.cumsum(jnp.einsum("bhld,bhle->bhlde", hk, hv, precision=HIGH), axis=2)
    layer_out = jnp.einsum("bhld,bhlde->bhle", hq, kv, precision=HIGH)

    scale = 1.0 / (d_head ** 0.5)
    layer_out = scale * layer_out / (denominator + eps)
    layer_out = jnp.transpose(layer_out, (2, 0, 1, 3)).reshape(
        slen, bsz, n_head * d_head)

    attn = jnp.einsum("lbk,mk->lbm", layer_out, w_o, precision=HIGH)
    x = h + attn
    mu = jnp.mean(x, axis=-1, keepdims=True)
    var = jnp.mean((x - mu) ** 2, axis=-1, keepdims=True)
    return (x - mu) / jnp.sqrt(var + eps) * ln_g.reshape(-1) + ln_b.reshape(-1)


if __name__ == "__main__":
    def run_case(n_head, d_head, d_model, slen, bsz, chunk, head_groups, seed):
        HD = n_head * d_head
        key = jax.random.PRNGKey(seed)
        k_h, k_q, k_k, k_v, k_o = jax.random.split(key, 5)

        h = jax.random.normal(k_h, (slen, bsz, d_model), jnp.float32)
        s_in = 1.0 / jnp.sqrt(jnp.float32(d_model))
        w_q = jax.random.normal(k_q, (HD, d_model), jnp.float32) * s_in
        w_k = jax.random.normal(k_k, (HD, d_model), jnp.float32) * s_in
        w_v = jax.random.normal(k_v, (HD, d_model), jnp.float32) * s_in
        w_o = jax.random.normal(k_o, (d_model, HD), jnp.float32) / jnp.sqrt(
            jnp.float32(HD))
        ln_g = jnp.ones((1, d_model), jnp.float32)
        ln_b = jnp.zeros((1, d_model), jnp.float32)

        # weights stored pre-transposed, bf16 (done once, outside the layer call)
        params = dict(
            w_q_t=w_q.T.astype(jnp.bfloat16),
            w_k_t=w_k.T.astype(jnp.bfloat16),
            w_v_t=w_v.T.astype(jnp.bfloat16),
            w_o_t=w_o.T.astype(jnp.bfloat16),
            ln_g=ln_g,
            ln_b=ln_b,
        )

        layer_fn = jax.jit(functools.partial(
            cuda_fast_weight_sum_linear_transformer_layer,
            n_head=n_head, d_head=d_head, chunk=chunk, head_groups=head_groups))

        out = jax.block_until_ready(layer_fn(h, params))
        ref = reference_forward(h, w_q, w_k, w_v, w_o, ln_g, ln_b, n_head, d_head)

        assert out.shape == (slen, bsz, d_model)
        assert bool(jnp.all(jnp.isfinite(out)))
        max_err = float(jnp.max(jnp.abs(out - ref)))
        if not bool(jnp.allclose(out, ref, atol=3e-2, rtol=3e-2)):
            raise AssertionError(f"mismatch vs reference, max abs err = {max_err}")
        return max_err

    # case 1: default single head group; state carried across 2 chunks (slen=32, chunk=16)
    run_case(n_head=2, d_head=64, d_model=128, slen=32, bsz=2, chunk=16,
             head_groups=None, seed=0)
    # case 2: 2 head groups (128-lane groups) + sequence padding (24 -> 32), bsz=1
    run_case(n_head=4, d_head=64, d_model=128, slen=24, bsz=1, chunk=16,
             head_groups=2, seed=1)

    print("KERNEL_OK")
</pallas_src>

<mosaic_0001>
module attributes {stable_mosaic.version = 11 : i64} {
  func.func @_oproj_ln_kernel(%arg0: i32, %arg1: i32, %arg2: memref<64x128xbf16, #tpu.memory_space<vmem>>, %arg3: memref<128x128xbf16, #tpu.memory_space<vmem>>, %arg4: memref<64x128xf32, #tpu.memory_space<vmem>>, %arg5: memref<1x128xf32, #tpu.memory_space<vmem>>, %arg6: memref<1x128xf32, #tpu.memory_space<vmem>>, %arg7: memref<64x128xf32, #tpu.memory_space<vmem>>, %arg8: memref<64x128xf32, #tpu.memory_space<vmem>>) attributes {dimension_semantics = [#tpu.dimension_semantics<parallel>, #tpu.dimension_semantics<arbitrary>], iteration_bounds = array<i64: 1, 1>, scalar_prefetch = 0 : i64, scratch_operands = 1 : i64, tpu.core_type = #tpu.core_type<tc>, window_params = [{transform_indices = @transform_0, window_bounds = array<i64: 64, 128>}, {transform_indices = @transform_1, window_bounds = array<i64: 128, 128>}, {transform_indices = @transform_2, window_bounds = array<i64: 64, 128>}, {pipeline_mode = #tpu.pipeline_mode<synchronous>, transform_indices = @transform_3, window_bounds = array<i64: 1, 128>}, {pipeline_mode = #tpu.pipeline_mode<synchronous>, transform_indices = @transform_4, window_bounds = array<i64: 1, 128>}, {transform_indices = @transform_5, window_bounds = array<i64: 64, 128>}]} {
    %c0_i32 = arith.constant 0 : i32
    %0 = arith.cmpi eq, %arg1, %c0_i32 : i32
    %1 = arith.extui %0 : i1 to i32
    %c0_i32_0 = arith.constant 0 : i32
    %2 = arith.cmpi ne, %1, %c0_i32_0 : i32
    scf.if %2 {
      %cst_10 = arith.constant 0.000000e+00 : f32
      %12 = vector.broadcast %cst_10 : f32 to vector<64x128xf32>
      %c0_11 = arith.constant 0 : index
      %c0_12 = arith.constant 0 : index
      %13 = vector.load %arg8[%c0_11, %c0_12] : memref<64x128xf32, #tpu.memory_space<vmem>>, vector<64x128xf32>
      tpu.vector_store %arg8[%c0_11, %c0_12], %12 {strides = array<i32>} : memref<64x128xf32, #tpu.memory_space<vmem>>, vector<64x128xf32>,
    } else {
    }
    %c0 = arith.constant 0 : index
    %c0_1 = arith.constant 0 : index
    %3 = vector.load %arg8[%c0, %c0_1] : memref<64x128xf32, #tpu.memory_space<vmem>>, vector<64x128xf32>
    %c0_2 = arith.constant 0 : index
    %c0_3 = arith.constant 0 : index
    %4 = vector.load %arg2[%c0_2, %c0_3] : memref<64x128xbf16, #tpu.memory_space<vmem>>, vector<64x128xbf16>
    %c0_4 = arith.constant 0 : index
    %c0_5 = arith.constant 0 : index
    %5 = vector.load %arg3[%c0_4, %c0_5] : memref<128x128xbf16, #tpu.memory_space<vmem>>, vector<128x128xbf16>
    %cst = arith.constant dense<0.000000e+00> : vector<64x128xf32>
    %6 = tpu.matmul %4, %5, %cst {dimension_numbers = #tpu.dot_dimension_numbers<[1], [0], [0], [1], [0, 0, 1, 1], [], []>} : vector<64x128xbf16>, vector<128x128xbf16>, vector<64x128xf32> -> vector<64x128xf32>
    %7 = arith.addf %3, %6 : vector<64x128xf32>
    %c0_6 = arith.constant 0 : index
    %c0_7 = arith.constant 0 : index
    %8 = vector.load %arg8[%c0_6, %c0_7] : memref<64x128xf32, #tpu.memory_space<vmem>>, vector<64x128xf32>
    tpu.vector_store %arg8[%c0_6, %c0_7], %7 {strides = array<i32>} : memref<64x128xf32, #tpu.memory_space<vmem>>, vector<64x128xf32>,
    %c0_i32_8 = arith.constant 0 : i32
    %9 = arith.cmpi eq, %arg1, %c0_i32_8 : i32
    %10 = arith.extui %9 : i1 to i32
    %c0_i32_9 = arith.constant 0 : i32
    %11 = arith.cmpi ne, %10, %c0_i32_9 : i32
    scf.if %11 {
      %c0_10 = arith.constant 0 : index
      %c0_11 = arith.constant 0 : index
      %12 = vector.load %arg4[%c0_10, %c0_11] : memref<64x128xf32, #tpu.memory_space<vmem>>, vector<64x128xf32>
      %c0_12 = arith.constant 0 : index
      %c0_13 = arith.constant 0 : index
      %13 = vector.load %arg8[%c0_12, %c0_13] : memref<64x128xf32, #tpu.memory_space<vmem>>, vector<64x128xf32>
      %14 = arith.addf %12, %13 : vector<64x128xf32>
      %cst_14 = arith.constant dense<0.000000e+00> : vector<64xf32>
      %15 = vector.multi_reduction <add>, %14, %cst_14 [1] : vector<64x128xf32> to vector<64xf32>
      %16 = vector.shape_cast %15 : vector<64xf32> to vector<64x1xf32>
      %cst_15 = arith.constant 1.280000e+02 : f32
      %17 = vector.broadcast %cst_15 : f32 to vector<64x1xf32>
      %18 = arith.divf %16, %17 : vector<64x1xf32>
      %19 = vector.broadcast %18 : vector<64x1xf32> to vector<64x128xf32>
      %20 = arith.subf %14, %19 : vector<64x128xf32>
      %21 = arith.mulf %20, %20 : vector<64x128xf32>
      %cst_16 = arith.constant dense<0.000000e+00> : vector<64xf32>
      %22 = vector.multi_reduction <add>, %21, %cst_16 [1] : vector<64x128xf32> to vector<64xf32>
      %23 = vector.shape_cast %22 : vector<64xf32> to vector<64x1xf32>
      %cst_17 = arith.constant 1.280000e+02 : f32
      %24 = vector.broadcast %cst_17 : f32 to vector<64x1xf32>
      %25 = arith.divf %23, %24 : vector<64x1xf32>
      %26 = vector.broadcast %18 : vector<64x1xf32> to vector<64x128xf32>
      %27 = arith.subf %14, %26 : vector<64x128xf32>
      %cst_18 = arith.constant 9.99999974E-6 : f32
      %28 = vector.broadcast %cst_18 : f32 to vector<64x1xf32>
      %29 = arith.addf %25, %28 : vector<64x1xf32>
      %30 = math.rsqrt %29 : vector<64x1xf32>
      %31 = vector.broadcast %30 : vector<64x1xf32> to vector<64x128xf32>
      %32 = arith.mulf %27, %31 : vector<64x128xf32>
      %c0_19 = arith.constant 0 : index
      %c0_20 = arith.constant 0 : index
      %33 = vector.load %arg5[%c0_19, %c0_20] : memref<1x128xf32, #tpu.memory_space<vmem>>, vector<1x128xf32>
      %34 = vector.broadcast %33 : vector<1x128xf32> to vector<64x128xf32>
      %35 = arith.mulf %32, %34 : vector<64x128xf32>
      %c0_21 = arith.constant 0 : index
      %c0_22 = arith.constant 0 : index
      %36 = vector.load %arg6[%c0_21, %c0_22] : memref<1x128xf32, #tpu.memory_space<vmem>>, vector<1x128xf32>
      %37 = vector.broadcast %36 : vector<1x128xf32> to vector<64x128xf32>
      %38 = arith.addf %35, %37 : vector<64x128xf32>
      %c0_23 = arith.constant 0 : index
      %c0_24 = arith.constant 0 : index
      %39 = vector.load %arg7[%c0_23, %c0_24] : memref<64x128xf32, #tpu.memory_space<vmem>>, vector<64x128xf32>
      tpu.vector_store %arg7[%c0_23, %c0_24], %38 {strides = array<i32>} : memref<64x128xf32, #tpu.memory_space<vmem>>, vector<64x128xf32>,
    } else {
    }
    return
  }
  func.func @transform_0(%arg0: i32, %arg1: i32) -> (i32, i32) {
    %c0_i32 = arith.constant 0 : i32
    return %arg0, %arg1 : i32, i32
  }
  func.func @transform_1(%arg0: i32, %arg1: i32) -> (i32, i32) {
    %c0_i32 = arith.constant 0 : i32
    %c0_i32_0 = arith.constant 0 : i32
    return %arg1, %c0_i32 : i32, i32
  }
  func.func @transform_2(%arg0: i32, %arg1: i32) -> (i32, i32) {
    %c0_i32 = arith.constant 0 : i32
    %c0_i32_0 = arith.constant 0 : i32
    return %arg0, %c0_i32 : i32, i32
  }
  func.func @transform_3(%arg0: i32, %arg1: i32) -> (i32, i32) {
    %c0_i32 = arith.constant 0 : i32
    %c0_i32_0 = arith.constant 0 : i32
    %c0_i32_1 = arith.constant 0 : i32
    return %c0_i32, %c0_i32_0 : i32, i32
  }
  func.func @transform_4(%arg0: i32, %arg1: i32) -> (i32, i32) {
    %c0_i32 = arith.constant 0 : i32
    %c0_i32_0 = arith.constant 0 : i32
    %c0_i32_1 = arith.constant 0 : i32
    return %c0_i32, %c0_i32_0 : i32, i32
  }
  func.func @transform_5(%arg0: i32, %arg1: i32) -> (i32, i32) {
    %c0_i32 = arith.constant 0 : i32
    %c0_i32_0 = arith.constant 0 : i32
    return %arg0, %c0_i32 : i32, i32
  }
}

module attributes {stable_mosaic.version = 11 : i64} {
  func.func @_fast_weight_kernel(%arg0: i32, %arg1: i32, %arg2: i32, %arg3: memref<1x16x128xf32, #tpu.memory_space<vmem>>, %arg4: memref<1x128x384xbf16, #tpu.memory_space<vmem>>, %arg5: memref<1x16x128xbf16, #tpu.memory_space<vmem>>, %arg6: memref<2x64x64xf32, #tpu.memory_space<vmem>>, %arg7: memref<2x1x64xf32, #tpu.memory_space<vmem>>, %arg8: memref<16x128xf32, #tpu.memory_space<vmem>>) attributes {dimension_semantics = [#tpu.dimension_semantics<parallel>, #tpu.dimension_semantics<parallel>, #tpu.dimension_semantics<arbitrary>], iteration_bounds = array<i64: 2, 1, 2>, scalar_prefetch = 0 : i64, scratch_operands = 3 : i64, tpu.core_type = #tpu.core_type<tc>, window_params = [{transform_indices = @transform_0, window_bounds = array<i64: 1, 16, 128>}, {transform_indices = @transform_1, window_bounds = array<i64: 1, 128, 384>}, {transform_indices = @transform_2, window_bounds = array<i64: 1, 16, 128>}]} {
    %c0_i32 = arith.constant 0 : i32
    %0 = arith.cmpi eq, %arg2, %c0_i32 : i32
    %1 = arith.extui %0 : i1 to i32
    %c0_i32_0 = arith.constant 0 : i32
    %2 = arith.cmpi ne, %1, %c0_i32_0 : i32
    scf.if %2 {
      %cst_65 = arith.constant 0.000000e+00 : f32
      %134 = vector.broadcast %cst_65 : f32 to vector<2x64x64xf32>
      %c0_66 = arith.constant 0 : index
      %c0_67 = arith.constant 0 : index
      %c0_68 = arith.constant 0 : index
      %135 = vector.load %arg6[%c0_66, %c0_67, %c0_68] : memref<2x64x64xf32, #tpu.memory_space<vmem>>, vector<2x64x64xf32>
      tpu.vector_store %arg6[%c0_66, %c0_67, %c0_68], %134 {strides = array<i32>} : memref<2x64x64xf32, #tpu.memory_space<vmem>>, vector<2x64x64xf32>,
      %cst_69 = arith.constant 0.000000e+00 : f32
      %136 = vector.broadcast %cst_69 : f32 to vector<2x1x64xf32>
      %c0_70 = arith.constant 0 : index
      %c0_71 = arith.constant 0 : index
      %c0_72 = arith.constant 0 : index
      %137 = vector.load %arg7[%c0_70, %c0_71, %c0_72] : memref<2x1x64xf32, #tpu.memory_space<vmem>>, vector<2x1x64xf32>
      tpu.vector_store %arg7[%c0_70, %c0_71, %c0_72], %136 {strides = array<i32>} : memref<2x1x64xf32, #tpu.memory_space<vmem>>, vector<2x1x64xf32>,
    } else {
    }
    %c0 = arith.constant 0 : index
    %c0_1 = arith.constant 0 : index
    %c0_2 = arith.constant 0 : index
    %3 = vector.load %arg3[%c0, %c0_1, %c0_2] : memref<1x16x128xf32, #tpu.memory_space<vmem>>, vector<1x16x128xf32>
    %4 = vector.shape_cast %3 : vector<1x16x128xf32> to vector<16x128xf32>
    %5 = arith.truncf %4 : vector<16x128xf32> to vector<16x128xbf16>
    %c0_3 = arith.constant 0 : index
    %c0_4 = arith.constant 0 : index
    %c0_5 = arith.constant 0 : index
    %6 = vector.load %arg4[%c0_3, %c0_4, %c0_5] : memref<1x128x384xbf16, #tpu.memory_space<vmem>>, vector<1x128x384xbf16>
    %7 = vector.shape_cast %6 : vector<1x128x384xbf16> to vector<128x384xbf16>
    %cst = arith.constant dense<0.000000e+00> : vector<16x384xf32>
    %8 = tpu.matmul %5, %7, %cst {dimension_numbers = #tpu.dot_dimension_numbers<[1], [0], [0], [1], [0, 0, 1, 1], [], []>} : vector<16x128xbf16>, vector<128x384xbf16>, vector<16x384xf32> -> vector<16x384xf32>
    %9 = vector.extract_strided_slice %8 {offsets = [0, 0], sizes = [16, 128], strides = [1, 1]} : vector<16x384xf32> to vector<16x128xf32>
    %10 = vector.extract_strided_slice %8 {offsets = [0, 128], sizes = [16, 128], strides = [1, 1]} : vector<16x384xf32> to vector<16x128xf32>
    %11 = vector.extract_strided_slice %8 {offsets = [0, 256], sizes = [16, 128], strides = [1, 1]} : vector<16x384xf32> to vector<16x128xf32>
    %cst_6 = arith.constant 0.000000e+00 : f32
    %12 = vector.broadcast %cst_6 : f32 to vector<16x128xf32>
    %13 = arith.cmpf ogt, %9, %12 : vector<16x128xf32>
    %cst_7 = arith.constant 1.000000e+00 : f32
    %14 = vector.broadcast %cst_7 : f32 to vector<16x128xf32>
    %15 = arith.addf %9, %14 : vector<16x128xf32>
    %16 = math.exp %9 : vector<16x128xf32>
    %17 = arith.select %13, %15, %16 : vector<16x128xi1>, vector<16x128xf32>
    %cst_8 = arith.constant 0.000000e+00 : f32
    %18 = vector.broadcast %cst_8 : f32 to vector<16x128xf32>
    %19 = arith.cmpf ogt, %10, %18 : vector<16x128xf32>
    %cst_9 = arith.constant 1.000000e+00 : f32
    %20 = vector.broadcast %cst_9 : f32 to vector<16x128xf32>
    %21 = arith.addf %10, %20 : vector<16x128xf32>
    %22 = math.exp %10 : vector<16x128xf32>
    %23 = arith.select %19, %21, %22 : vector<16x128xi1>, vector<16x128xf32>
    %24 = tpu.iota {dimensions = array<i32: 0>} : vector<16x16xi32>
    %25 = tpu.iota {dimensions = array<i32: 1>} : vector<16x16xi32>
    %26 = arith.cmpi sle, %25, %24 : vector<16x16xi32>
    %27 = vector.extract_strided_slice %17 {offsets = [0, 0], sizes = [16, 64], strides = [1, 1]} : vector<16x128xf32> to vector<16x64xf32>
    %28 = vector.extract_strided_slice %23 {offsets = [0, 0], sizes = [16, 64], strides = [1, 1]} : vector<16x128xf32> to vector<16x64xf32>
    %29 = vector.extract_strided_slice %11 {offsets = [0, 0], sizes = [16, 64], strides = [1, 1]} : vector<16x128xf32> to vector<16x64xf32>
    %cst_10 = arith.constant dense<0.000000e+00> : vector<16xf32>
    %30 = vector.multi_reduction <add>, %27, %cst_10 [1] : vector<16x64xf32> to vector<16xf32>
    %31 = vector.shape_cast %30 : vector<16xf32> to vector<16x1xf32>
    %32 = vector.broadcast %31 : vector<16x1xf32> to vector<16x64xf32>
    %33 = arith.divf %27, %32 : vector<16x64xf32>
    %cst_11 = arith.constant dense<0.000000e+00> : vector<16xf32>
    %34 = vector.multi_reduction <add>, %28, %cst_11 [1] : vector<16x64xf32> to vector<16xf32>
    %35 = vector.shape_cast %34 : vector<16xf32> to vector<16x1xf32>
    %36 = vector.broadcast %35 : vector<16x1xf32> to vector<16x64xf32>
    %37 = arith.divf %28, %36 : vector<16x64xf32>
    %38 = arith.truncf %33 : vector<16x64xf32> to vector<16x64xbf16>
    %39 = arith.truncf %37 : vector<16x64xf32> to vector<16x64xbf16>
    %40 = arith.truncf %29 : vector<16x64xf32> to vector<16x64xbf16>
    %c0_12 = arith.constant 0 : index
    %c0_13 = arith.constant 0 : index
    %c0_14 = arith.constant 0 : index
    %41 = vector.load %arg6[%c0_12, %c0_13, %c0_14] : memref<2x64x64xf32, #tpu.memory_space<vmem>>, vector<1x64x64xf32>
    %42 = vector.shape_cast %41 : vector<1x64x64xf32> to vector<64x64xf32>
    %c0_15 = arith.constant 0 : index
    %c0_16 = arith.constant 0 : index
    %c0_17 = arith.constant 0 : index
    %43 = vector.load %arg7[%c0_15, %c0_16, %c0_17] : memref<2x1x64xf32, #tpu.memory_space<vmem>>, vector<1x1x64xf32>
    %44 = vector.shape_cast %43 : vector<1x1x64xf32> to vector<1x64xf32>
    "tpu.trace_start"() <{level = 10 : i32, message = "td,sd->ts"}> : () -> ()
    %cst_18 = arith.constant dense<0.000000e+00> : vector<16x16xf32>
    %45 = tpu.matmul %38, %39, %cst_18 {dimension_numbers = #tpu.dot_dimension_numbers<[1], [1], [0], [0], [0, 0, 1, 0], [], []>} : vector<16x64xbf16>, vector<16x64xbf16>, vector<16x16xf32> -> vector<16x16xf32>
    %cst_19 = arith.constant 0.000000e+00 : f32
    "tpu.trace_stop"() : () -> ()
    %46 = vector.broadcast %cst_19 : f32 to vector<16x16xf32>
    %47 = arith.select %26, %45, %46 : vector<16x16xi1>, vector<16x16xf32>
    %48 = arith.truncf %47 : vector<16x16xf32> to vector<16x16xbf16>
    %cst_20 = arith.constant dense<0.000000e+00> : vector<16x64xf32>
    %49 = tpu.matmul %48, %40, %cst_20 {dimension_numbers = #tpu.dot_dimension_numbers<[1], [0], [0], [1], [0, 0, 1, 1], [], []>} : vector<16x16xbf16>, vector<16x64xbf16>, vector<16x64xf32> -> vector<16x64xf32>
    %50 = arith.truncf %42 : vector<64x64xf32> to vector<64x64xbf16>
    %cst_21 = arith.constant dense<0.000000e+00> : vector<16x64xf32>
    %51 = tpu.matmul %38, %50, %cst_21 {dimension_numbers = #tpu.dot_dimension_numbers<[1], [0], [0], [1], [0, 0, 1, 1], [], []>} : vector<16x64xbf16>, vector<64x64xbf16>, vector<16x64xf32> -> vector<16x64xf32>
    %52 = arith.addf %49, %51 : vector<16x64xf32>
    %cst_22 = arith.constant dense<0.000000e+00> : vector<16xf32>
    %53 = vector.multi_reduction <add>, %47, %cst_22 [1] : vector<16x16xf32> to vector<16xf32>
    %54 = vector.shape_cast %53 : vector<16xf32> to vector<16x1xf32>
    %55 = vector.broadcast %44 : vector<1x64xf32> to vector<16x64xf32>
    %56 = arith.mulf %33, %55 : vector<16x64xf32>
    %cst_23 = arith.constant dense<0.000000e+00> : vector<16xf32>
    %57 = vector.multi_reduction <add>, %56, %cst_23 [1] : vector<16x64xf32> to vector<16xf32>
    %58 = vector.shape_cast %57 : vector<16xf32> to vector<16x1xf32>
    %59 = arith.addf %54, %58 : vector<16x1xf32>
    %cst_24 = arith.constant 1.250000e-01 : f32
    %60 = vector.broadcast %cst_24 : f32 to vector<16x64xf32>
    %61 = arith.mulf %60, %52 : vector<16x64xf32>
    %cst_25 = arith.constant 9.99999974E-6 : f32
    %62 = vector.broadcast %cst_25 : f32 to vector<16x1xf32>
    %63 = arith.addf %59, %62 : vector<16x1xf32>
    %64 = vector.broadcast %63 : vector<16x1xf32> to vector<16x64xf32>
    %65 = arith.divf %61, %64 : vector<16x64xf32>
    %c0_26 = arith.constant 0 : index
    %c0_27 = arith.constant 0 : index
    %66 = vector.load %arg8[%c0_26, %c0_27] : memref<16x128xf32, #tpu.memory_space<vmem>>, vector<16x64xf32>
    tpu.vector_store %arg8[%c0_26, %c0_27], %65 {strides = array<i32>} : memref<16x128xf32, #tpu.memory_space<vmem>>, vector<16x64xf32>,
    "tpu.trace_start"() <{level = 10 : i32, message = "td,te->de"}> : () -> ()
    %cst_28 = arith.constant dense<0.000000e+00> : vector<64x64xf32>
    %67 = tpu.matmul %39, %40, %cst_28 {dimension_numbers = #tpu.dot_dimension_numbers<[0], [0], [1], [1], [0, 1, 1, 1], [], []>} : vector<16x64xbf16>, vector<16x64xbf16>, vector<64x64xf32> -> vector<64x64xf32>
    "tpu.trace_stop"() : () -> ()
    %68 = arith.addf %42, %67 : vector<64x64xf32>
    %c0_29 = arith.constant 0 : index
    %c0_30 = arith.constant 0 : index
    %c0_31 = arith.constant 0 : index
    %69 = vector.load %arg6[%c0_29, %c0_30, %c0_31] : memref<2x64x64xf32, #tpu.memory_space<vmem>>, vector<1x64x64xf32>
    %70 = vector.shape_cast %69 : vector<1x64x64xf32> to vector<64x64xf32>
    %71 = vector.shape_cast %68 : vector<64x64xf32> to vector<1x64x64xf32>
    tpu.vector_store %arg6[%c0_29, %c0_30, %c0_31], %71 {strides = array<i32>} : memref<2x64x64xf32, #tpu.memory_space<vmem>>, vector<1x64x64xf32>,
    %cst_32 = arith.constant dense<0.000000e+00> : vector<64xf32>
    %72 = vector.multi_reduction <add>, %37, %cst_32 [0] : vector<16x64xf32> to vector<64xf32>
    %73 = vector.shape_cast %72 : vector<64xf32> to vector<1x64xf32>
    %74 = arith.addf %44, %73 : vector<1x64xf32>
    %c0_33 = arith.constant 0 : index
    %c0_34 = arith.constant 0 : index
    %c0_35 = arith.constant 0 : index
    %75 = vector.load %arg7[%c0_33, %c0_34, %c0_35] : memref<2x1x64xf32, #tpu.memory_space<vmem>>, vector<1x1x64xf32>
    %76 = vector.shape_cast %75 : vector<1x1x64xf32> to vector<1x64xf32>
    %77 = vector.shape_cast %74 : vector<1x64xf32> to vector<1x1x64xf32>
    tpu.vector_store %arg7[%c0_33, %c0_34, %c0_35], %77 {strides = array<i32>} : memref<2x1x64xf32, #tpu.memory_space<vmem>>, vector<1x1x64xf32>,
    %78 = vector.extract_strided_slice %17 {offsets = [0, 64], sizes = [16, 64], strides = [1, 1]} : vector<16x128xf32> to vector<16x64xf32>
    %79 = vector.extract_strided_slice %23 {offsets = [0, 64], sizes = [16, 64], strides = [1, 1]} : vector<16x128xf32> to vector<16x64xf32>
    %80 = vector.extract_strided_slice %11 {offsets = [0, 64], sizes = [16, 64], strides = [1, 1]} : vector<16x128xf32> to vector<16x64xf32>
    %cst_36 = arith.constant dense<0.000000e+00> : vector<16xf32>
    %81 = vector.multi_reduction <add>, %78, %cst_36 [1] : vector<16x64xf32> to vector<16xf32>
    %82 = vector.shape_cast %81 : vector<16xf32> to vector<16x1xf32>
    %83 = vector.broadcast %82 : vector<16x1xf32> to vector<16x64xf32>
    %84 = arith.divf %78, %83 : vector<16x64xf32>
    %cst_37 = arith.constant dense<0.000000e+00> : vector<16xf32>
    %85 = vector.multi_reduction <add>, %79, %cst_37 [1] : vector<16x64xf32> to vector<16xf32>
    %86 = vector.shape_cast %85 : vector<16xf32> to vector<16x1xf32>
    %87 = vector.broadcast %86 : vector<16x1xf32> to vector<16x64xf32>
    %88 = arith.divf %79, %87 : vector<16x64xf32>
    %89 = arith.truncf %84 : vector<16x64xf32> to vector<16x64xbf16>
    %90 = arith.truncf %88 : vector<16x64xf32> to vector<16x64xbf16>
    %91 = arith.truncf %80 : vector<16x64xf32> to vector<16x64xbf16>
    %c1 = arith.constant 1 : index
    %c0_38 = arith.constant 0 : index
    %c0_39 = arith.constant 0 : index
    %92 = vector.load %arg6[%c1, %c0_38, %c0_39] : memref<2x64x64xf32, #tpu.memory_space<vmem>>, vector<1x64x64xf32>
    %93 = vector.shape_cast %92 : vector<1x64x64xf32> to vector<64x64xf32>
    %c1_40 = arith.constant 1 : index
    %c0_41 = arith.constant 0 : index
    %c0_42 = arith.constant 0 : index
    %94 = vector.load %arg7[%c1_40, %c0_41, %c0_42] : memref<2x1x64xf32, #tpu.memory_space<vmem>>, vector<1x1x64xf32>
    %95 = vector.shape_cast %94 : vector<1x1x64xf32> to vector<1x64xf32>
    "tpu.trace_start"() <{level = 10 : i32, message = "td,sd->ts"}> : () -> ()
    %cst_43 = arith.constant dense<0.000000e+00> : vector<16x16xf32>
    %96 = tpu.matmul %89, %90, %cst_43 {dimension_numbers = #tpu.dot_dimension_numbers<[1], [1], [0], [0], [0, 0, 1, 0], [], []>} : vector<16x64xbf16>, vector<16x64xbf16>, vector<16x16xf32> -> vector<16x16xf32>
    %cst_44 = arith.constant 0.000000e+00 : f32
    "tpu.trace_stop"() : () -> ()
    %97 = vector.broadcast %cst_44 : f32 to vector<16x16xf32>
    %98 = arith.select %26, %96, %97 : vector<16x16xi1>, vector<16x16xf32>
    %99 = arith.truncf %98 : vector<16x16xf32> to vector<16x16xbf16>
    %cst_45 = arith.constant dense<0.000000e+00> : vector<16x64xf32>
    %100 = tpu.matmul %99, %91, %cst_45 {dimension_numbers = #tpu.dot_dimension_numbers<[1], [0], [0], [1], [0, 0, 1, 1], [], []>} : vector<16x16xbf16>, vector<16x64xbf16>, vector<16x64xf32> -> vector<16x64xf32>
    %101 = arith.truncf %93 : vector<64x64xf32> to vector<64x64xbf16>
    %cst_46 = arith.constant dense<0.000000e+00> : vector<16x64xf32>
    %102 = tpu.matmul %89, %101, %cst_46 {dimension_numbers = #tpu.dot_dimension_numbers<[1], [0], [0], [1], [0, 0, 1, 1], [], []>} : vector<16x64xbf16>, vector<64x64xbf16>, vector<16x64xf32> -> vector<16x64xf32>
    %103 = arith.addf %100, %102 : vector<16x64xf32>
    %cst_47 = arith.constant dense<0.000000e+00> : vector<16xf32>
    %104 = vector.multi_reduction <add>, %98, %cst_47 [1] : vector<16x16xf32> to vector<16xf32>
    %105 = vector.shape_cast %104 : vector<16xf32> to vector<16x1xf32>
    %106 = vector.broadcast %95 : vector<1x64xf32> to vector<16x64xf32>
    %107 = arith.mulf %84, %106 : vector<16x64xf32>
    %cst_48 = arith.constant dense<0.000000e+00> : vector<16xf32>
    %108 = vector.multi_reduction <add>, %107, %cst_48 [1] : vector<16x64xf32> to vector<16xf32>
    %109 = vector.shape_cast %108 : vector<16xf32> to vector<16x1xf32>
    %110 = arith.addf %105, %109 : vector<16x1xf32>
    %cst_49 = arith.constant 1.250000e-01 : f32
    %111 = vector.broadcast %cst_49 : f32 to vector<16x64xf32>
    %112 = arith.mulf %111, %103 : vector<16x64xf32>
    %cst_50 = arith.constant 9.99999974E-6 : f32
    %113 = vector.broadcast %cst_50 : f32 to vector<16x1xf32>
    %114 = arith.addf %110, %113 : vector<16x1xf32>
    %115 = vector.broadcast %114 : vector<16x1xf32> to vector<16x64xf32>
    %116 = arith.divf %112, %115 : vector<16x64xf32>
    %c0_51 = arith.constant 0 : index
    %c64 = arith.constant 64 : index
    %117 = vector.load %arg8[%c0_51, %c64] : memref<16x128xf32, #tpu.memory_space<vmem>>, vector<16x64xf32>
    tpu.vector_store %arg8[%c0_51, %c64], %116 {strides = array<i32>} : memref<16x128xf32, #tpu.memory_space<vmem>>, vector<16x64xf32>,
    "tpu.trace_start"() <{level = 10 : i32, message = "td,te->de"}> : () -> ()
    %cst_52 = arith.constant dense<0.000000e+00> : vector<64x64xf32>
    %118 = tpu.matmul %90, %91, %cst_52 {dimension_numbers = #tpu.dot_dimension_numbers<[0], [0], [1], [1], [0, 1, 1, 1], [], []>} : vector<16x64xbf16>, vector<16x64xbf16>, vector<64x64xf32> -> vector<64x64xf32>
    "tpu.trace_stop"() : () -> ()
    %119 = arith.addf %93, %118 : vector<64x64xf32>
    %c1_53 = arith.constant 1 : index
    %c0_54 = arith.constant 0 : index
    %c0_55 = arith.constant 0 : index
    %120 = vector.load %arg6[%c1_53, %c0_54, %c0_55] : memref<2x64x64xf32, #tpu.memory_space<vmem>>, vector<1x64x64xf32>
    %121 = vector.shape_cast %120 : vector<1x64x64xf32> to vector<64x64xf32>
    %122 = vector.shape_cast %119 : vector<64x64xf32> to vector<1x64x64xf32>
    tpu.vector_store %arg6[%c1_53, %c0_54, %c0_55], %122 {strides = array<i32>} : memref<2x64x64xf32, #tpu.memory_space<vmem>>, vector<1x64x64xf32>,
    %cst_56 = arith.constant dense<0.000000e+00> : vector<64xf32>
    %123 = vector.multi_reduction <add>, %88, %cst_56 [0] : vector<16x64xf32> to vector<64xf32>
    %124 = vector.shape_cast %123 : vector<64xf32> to vector<1x64xf32>
    %125 = arith.addf %95, %124 : vector<1x64xf32>
    %c1_57 = arith.constant 1 : index
    %c0_58 = arith.constant 0 : index
    %c0_59 = arith.constant 0 : index
    %126 = vector.load %arg7[%c1_57, %c0_58, %c0_59] : memref<2x1x64xf32, #tpu.memory_space<vmem>>, vector<1x1x64xf32>
    %127 = vector.shape_cast %126 : vector<1x1x64xf32> to vector<1x64xf32>
    %128 = vector.shape_cast %125 : vector<1x64xf32> to vector<1x1x64xf32>
    tpu.vector_store %arg7[%c1_57, %c0_58, %c0_59], %128 {strides = array<i32>} : memref<2x1x64xf32, #tpu.memory_space<vmem>>, vector<1x1x64xf32>,
    %c0_60 = arith.constant 0 : index
    %c0_61 = arith.constant 0 : index
    %129 = vector.load %arg8[%c0_60, %c0_61] : memref<16x128xf32, #tpu.memory_space<vmem>>, vector<16x128xf32>
    %130 = arith.truncf %129 : vector<16x128xf32> to vector<16x128xbf16>
    %c0_62 = arith.constant 0 : index
    %c0_63 = arith.constant 0 : index
    %c0_64 = arith.constant 0 : index
    %131 = vector.load %arg5[%c0_62, %c0_63, %c0_64] : memref<1x16x128xbf16, #tpu.memory_space<vmem>>, vector<1x16x128xbf16>
    %132 = vector.shape_cast %131 : vector<1x16x128xbf16> to vector<16x128xbf16>
    %133 = vector.shape_cast %130 : vector<16x128xbf16> to vector<1x16x128xbf16>
    tpu.vector_store %arg5[%c0_62, %c0_63, %c0_64], %133 {strides = array<i32>} : memref<1x16x128xbf16, #tpu.memory_space<vmem>>, vector<1x16x128xbf16>,
    return
  }
  func.func @transform_0(%arg0: i32, %arg1: i32, %arg2: i32) -> (i32, i32, i32) {
    %c0_i32 = arith.constant 0 : i32
    %c0_i32_0 = arith.constant 0 : i32
    return %arg0, %arg2, %c0_i32 : i32, i32, i32
  }
  func.func @transform_1(%arg0: i32, %arg1: i32, %arg2: i32) -> (i32, i32, i32) {
    %c0_i32 = arith.constant 0 : i32
    %c0_i32_0 = arith.constant 0 : i32
    %c0_i32_1 = arith.constant 0 : i32
    return %arg1, %c0_i32, %c0_i32_0 : i32, i32, i32
  }
  func.func @transform_2(%arg0: i32, %arg1: i32, %arg2: i32) -> (i32, i32, i32) {
    %c0_i32 = arith.constant 0 : i32
    return %arg0, %arg2, %arg1 : i32, i32, i32
  }
}

</mosaic_0001>

<bundles_post_ra>
// kernel: cuda_fast_weight_sum_linear_transformer_layer.3
= control target key start
LH: loop header
LB: loop body
LE: loop exit
PB: predicated region body
PF: predicated region fallthrough
CT: control target
= control target key end

     0   :  { %s630_s1 = inlined_call_operand.vmem [shape: bf16[128,128], index: 1, kind: input, shape index: {}]   ;;  %s631_s0 = inlined_call_operand.vmem [shape: bf16[64,128], index: 0, kind: input, shape index: {}]   ;;  %s632_s2 = inlined_call_operand.vmem [shape: f32[64,128], index: 2, kind: input, shape index: {}]   ;;  %s633_s3 = inlined_call_operand.vmem [shape: f32[1,128], index: 3, kind: input, shape index: {}]   ;;  %s634_s4 = inlined_call_operand.vmem [shape: f32[1,128], index: 4, kind: input, shape index: {}]   ;;  %s635_s5 = inlined_call_operand.vmem [shape: f32[64,128], index: 5, kind: output, shape index: {}]  }
   0x1   :  { %v442_v0 = vld [vmem:[%s630_s1] sm:$0xff]   ;;  %v443_v1 = vld [vmem:[%s630_s1 + $0x8] sm:$0xff]   ;;  %v444_v2 = vld [vmem:[%s630_s1 + $0x10] sm:$0xff]  }
   0x2   :  { %402 = vmatprep.subr.bf16.mxu0 %v442_v0  ;;  %426 = vmatprep.subr.bf16.mxu1 %v442_v0  ;;  %v445_v3 = vld [vmem:[%s630_s1 + $0x18] sm:$0xff]   ;;  %v450_v4 = vld [vmem:[%s631_s0] sm:$0xff]   ;;  %v452_v5 = vld [vmem:[%s631_s0 + $0x10] sm:$0xff]  }
   0x3   :  { %403 = vmatpush3.bf16.msra.mxu0 %v442_v0  ;;  %434 = vmatpush3.bf16.msra.mxu1 %v442_v0  ;;  %v446_v6 = vld [vmem:[%s630_s1 + $0x20] sm:$0xff]   ;;  %v447_v7 = vld [vmem:[%s630_s1 + $0x28] sm:$0xff]   ;;  %v448_v8 = vld [vmem:[%s630_s1 + $0x30] sm:$0xff]  }
   0x4   :  { %404 = vmatprep.subr.bf16.mxu0 %v443_v1  ;;  %427 = vmatprep.subr.bf16.mxu1 %v443_v1  ;;  %v449_v9 = vld [vmem:[%s630_s1 + $0x38] sm:$0xff]   ;;  %v451_v10 = vld [vmem:[%s631_s0 + $0x8] sm:$0xff]   ;;  %v223_v12 = vld [vmem:[%s632_s2 + $0x10] sm:$0xff] }
   0x5   :  { %418 = vmatprep.mubr.bf16.mxu0 %v450_v4  ;;  %422 = vmatprep.mubr.bf16.mxu1 %v452_v5  ;;  %v453_v11 = vld [vmem:[%s631_s0 + $0x18] sm:$0xff]   ;;  %v221_v13 = vld [vmem:[%s632_s2] sm:$0xff]  ;;  %v226_v28 = vld [vmem:[%s632_s2 + $0x28] sm:$0xff] }
   0x6   :  { %v225_v19 = vld [vmem:[%s632_s2 + $0x20] sm:$0xff]  ;;  %v224_v22 = vld [vmem:[%s632_s2 + $0x18] sm:$0xff]  ;;  %v222_v29 = vld [vmem:[%s632_s2 + $0x8] sm:$0xff] }
   0x7   :  { %405 = vmatpush3.bf16.msra.mxu0 %v443_v1  ;;  %435 = vmatpush3.bf16.msra.mxu1 %v443_v1  ;;  %v228_v31 = vld [vmem:[%s632_s2 + $0x38] sm:$0xff]  ;;  %v227_v33 = vld [vmem:[%s632_s2 + $0x30] sm:$0xff] }
   0x8   :  { %406 = vmatprep.subr.bf16.mxu0 %v444_v2  ;;  %428 = vmatprep.subr.bf16.mxu1 %v444_v2 }
   0xb   :  { %407 = vmatpush3.bf16.msra.mxu0 %v444_v2  ;;  %436 = vmatpush3.bf16.msra.mxu1 %v444_v2 }
   0xc   :  { %408 = vmatprep.subr.bf16.mxu0 %v445_v3  ;;  %429 = vmatprep.subr.bf16.mxu1 %v445_v3 }
   0xf   :  { %409 = vmatpush3.bf16.msra.mxu0 %v445_v3  ;;  %437 = vmatpush3.bf16.msra.mxu1 %v445_v3 }
  0x10   :  { %410 = vmatprep.subr.bf16.mxu0 %v446_v6  ;;  %430 = vmatprep.subr.bf16.mxu1 %v446_v6 }
  0x13   :  { %411 = vmatpush3.bf16.msra.mxu0 %v446_v6  ;;  %438 = vmatpush3.bf16.msra.mxu1 %v446_v6 }
  0x14   :  { %412 = vmatprep.subr.bf16.mxu0 %v447_v7  ;;  %431 = vmatprep.subr.bf16.mxu1 %v447_v7 }
  0x17   :  { %413 = vmatpush3.bf16.msra.mxu0 %v447_v7  ;;  %439 = vmatpush3.bf16.msra.mxu1 %v447_v7 }
  0x18   :  { %414 = vmatprep.subr.bf16.mxu0 %v448_v8  ;;  %432 = vmatprep.subr.bf16.mxu1 %v448_v8 }
  0x1b   :  { %415 = vmatpush3.bf16.msra.mxu0 %v448_v8  ;;  %440 = vmatpush3.bf16.msra.mxu1 %v448_v8 }
  0x1c   :  { %416 = vmatprep.subr.bf16.mxu0 %v449_v9  ;;  %433 = vmatprep.subr.bf16.mxu1 %v449_v9 }
  0x1f   :  { %417 = vmatpush3.bf16.msra.mxu0 %v449_v9  ;;  %441 = vmatpush3.bf16.msra.mxu1 %v449_v9 }
  0x22   :  { %419 = vmatmul.mubr.bf16.vlgmr.msra.gmra.mrb[0].mxu0 %v451_v10  ;;  %423 = vmatmul.mubr.bf16.vlgmr.msra.gmra.mrb[0].mxu1 %v453_v11 }
  0xf5   :  { %v420_v14 = vpop.f32.mrb[0].mxu0  ;;  %v424_v15 = vpop.f32.mrb[0].mxu1 }
  0xf6   :  { %v239_v16 = vadd.f32 %v420_v14, %v223_v12  ;;  %v171_v17 = vpop.f32.mrb[1].mxu0  ;;  %v187_v18 = vpop.f32.mrb[1].mxu1  ;;  %v243_v35 = vadd.f32 %v424_v15, %v227_v33 }
  0xf7   :  { %v237_v20 = vadd.f32 %v221_v13, %v171_v17  ;;  %v421_v21 = vpop.f32.mrb[2].mxu0  ;;  %v425_v23 = vpop.f32.mrb[2].mxu1  ;;  %v241_v26 = vadd.f32 %v225_v19, %v187_v18 }
  0xf8   :  { %249 = vadd.xlane.f32.xlu1 %v239_v16  ;;  %v174_v24 = vpop.f32.mrb[3].mxu0  ;;  %v190_v25 = vpop.f32.mrb[3].mxu1  ;;  %v240_v27 = vadd.f32 %v421_v21, %v224_v22  ;;  %v244_v34 = vadd.f32 %v425_v23, %v228_v31 }
  0xf9   :  { %245 = vadd.xlane.f32.xlu0 %v237_v20  ;;  %v242_v30 = vadd.f32 %v226_v28, %v190_v25  ;;  %v238_v32 = vadd.f32 %v222_v29, %v174_v24  ;;  %v388_v24 = vld [vmem:[%s633_s3] ss:$0 sm:$0xff] }
  0xfa   :  { %v389_v28 = vld [vmem:[%s634_s4] ss:$0 sm:$0xff] }
  0xfc   :  { %251 = vadd.xlane.f32.xlu1 %v240_v27 }
  0xfd   :  { %253 = vadd.xlane.f32.xlu0 %v241_v26 }
 0x100   :  { %255 = vadd.xlane.f32.xlu1 %v242_v30 }
 0x101   :  { %247 = vadd.xlane.f32.xlu0 %v238_v32 }
 0x104   :  { %259 = vadd.xlane.f32.xlu1 %v244_v34 }
 0x105   :  { %257 = vadd.xlane.f32.xlu0 %v243_v35 }
 0x185   :  { %v250_v36 = vpop.xlane.xlu1 %249 }
 0x186   :  { %v264_v37 = vmul.f32 0.0078125, %v250_v36  ;;  %v246_v38 = vpop.xlane.xlu0 %245 }
 0x187   :  { %v262_v39 = vmul.f32 0.0078125, %v246_v38 }
 0x188   :  { %v560_v40 = vsub.f32 %v239_v16, %v264_v37 }
 0x189   :  { %v252_v41 = vpop.xlane.xlu1 %251  ;;  %v562_v42 = vsub.f32 %v237_v20, %v262_v39 }
 0x18a   :  { %v265_v43 = vmul.f32 0.0078125, %v252_v41  ;;  %v254_v44 = vpop.xlane.xlu0 %253  ;;  %v280_v45 = vmul.f32 %v560_v40, %v560_v40 }
 0x18b   :  { %v266_v46 = vmul.f32 0.0078125, %v254_v44  ;;  %v278_v52 = vmul.f32 %v562_v42, %v562_v42 }
 0x18c   :  { %v566_v47 = vsub.f32 %v240_v27, %v265_v43  ;;  %290 = vadd.xlane.f32.xlu0 %v280_v45 }
 0x18d   :  { %v256_v48 = vpop.xlane.xlu1 %255  ;;  %v568_v49 = vsub.f32 %v241_v26, %v266_v46 }
 0x18e   :  { %v248_v50 = vpop.xlane.xlu0 %247  ;;  %v281_v51 = vmul.f32 %v566_v47, %v566_v47  ;;  %v267_v53 = vmul.f32 0.0078125, %v256_v48 }
 0x18f   :  { %v263_v54 = vmul.f32 0.0078125, %v248_v50  ;;  %v282_v58 = vmul.f32 %v568_v49, %v568_v49 }
 0x190   :  { %292 = vadd.xlane.f32.xlu1 %v281_v51  ;;  %286 = vadd.xlane.f32.xlu0 %v278_v52  ;;  %v578_v59 = vsub.f32 %v242_v30, %v267_v53 }
 0x191   :  { %v574_v55 = vsub.f32 %v238_v32, %v263_v54  ;;  %v260_v56 = vpop.xlane.xlu1 %259 }
 0x192   :  { %v258_v57 = vpop.xlane.xlu0 %257  ;;  %v269_v60 = vmul.f32 0.0078125, %v260_v56  ;;  %v283_v1 = vmul.f32 %v578_v59, %v578_v59 }
 0x193   :  { %v268_v61 = vmul.f32 0.0078125, %v258_v57  ;;  %v279_v62 = vmul.f32 %v574_v55, %v574_v55 }
 0x194   :  { %294 = vadd.xlane.f32.xlu0 %v282_v58  ;;  %v584_v0 = vsub.f32 %v244_v34, %v269_v60 }
 0x195   :  { %v582_v63 = vsub.f32 %v243_v35, %v268_v61  ;;  %288 = vadd.xlane.f32.xlu1 %v279_v62 }
 0x196   :  { %v285_v3 = vmul.f32 %v584_v0, %v584_v0 }
 0x197   :  { %v284_v2 = vmul.f32 %v582_v63, %v582_v63 }
 0x199   :  { %296 = vadd.xlane.f32.xlu1 %v283_v1  ;;  %298 = vadd.xlane.f32.xlu0 %v284_v2 }
 0x19d   :  { %300 = vadd.xlane.f32.xlu1 %v285_v3 }
 0x219   :  { %v291_v4 = vpop.xlane.xlu0 %290 }
 0x21a   :  { %v304_v5 = vmul.f32 0.0078125, %v291_v4 }
 0x21c   :  { %v312_v6 = vadd.f32 1e-05, %v304_v5 }
 0x21d   :  { %v293_v7 = vpop.xlane.xlu1 %292  ;;  %v287_v8 = vpop.xlane.xlu0 %286 }
 0x21e   :  { %454 = vrsqrt.f32 %v312_v6  ;;  %v305_v9 = vmul.f32 0.0078125, %v293_v7  ;;  %v302_v10 = vmul.f32 0.0078125, %v287_v8 }
 0x220   :  { %v313_v11 = vadd.f32 1e-05, %v305_v9  ;;  %v310_v12 = vadd.f32 1e-05, %v302_v10 }
 0x221   :  { %v295_v13 = vpop.xlane.xlu0 %294 }
 0x222   :  { %456 = vrsqrt.f32 %v313_v11  ;;  %v306_v14 = vmul.f32 0.0078125, %v295_v13  ;;  %v289_v15 = vpop.xlane.xlu1 %288 }
 0x223   :  { %458 = vrsqrt.f32 %v310_v12  ;;  %v303_v16 = vmul.f32 0.0078125, %v289_v15 }
 0x224   :  { %v314_v17 = vadd.f32 1e-05, %v306_v14 }
 0x225   :  { %v311_v18 = vadd.f32 1e-05, %v303_v16 }
 0x226   :  { %460 = vrsqrt.f32 %v314_v17  ;;  %v297_v19 = vpop.xlane.xlu1 %296  ;;  %v299_v20 = vpop.xlane.xlu0 %298 }
 0x227   :  { %462 = vrsqrt.f32 %v311_v18  ;;  %v307_v21 = vmul.f32 0.0078125, %v297_v19  ;;  %v308_v22 = vmul.f32 0.0078125, %v299_v20 }
 0x228   :  { %v455_v23 = vpop.eup %454 }
 0x229   :  { %v328_v25 = vmul.f32 %v455_v23, %v560_v40  ;;  %v315_v26 = vadd.f32 1e-05, %v307_v21  ;;  %v316_v27 = vadd.f32 1e-05, %v308_v22 }
 0x22a   :  { %v301_v29 = vpop.xlane.xlu1 %300 }
 0x22b   :  { %v343_v30 = vmul.f32 %v388_v24, %v328_v25  ;;  %464 = vrsqrt.f32 %v315_v26  ;;  %v309_v31 = vmul.f32 0.0078125, %v301_v29 }
 0x22c   :  { %v457_v32 = vpop.eup %456  ;;  %466 = vrsqrt.f32 %v316_v27 }
 0x22d   :  { %v459_v33 = vpop.eup %458  ;;  %v358_v34 = vadd.f32 %v389_v28, %v343_v30  ;;  %v329_v35 = vmul.f32 %v457_v32, %v566_v47  ;;  %v317_v36 = vadd.f32 1e-05, %v309_v31 }
 0x22e   :  { %v326_v37 = vmul.f32 %v459_v33, %v562_v42 }
 0x22f   :  { %366 = vst [vmem:[%s635_s5 + $0x10] sm:$0xff] %v358_v34  ;;  %v344_v38 = vmul.f32 %v388_v24, %v329_v35  ;;  %468 = vrsqrt.f32 %v317_v36 }
 0x230   :  { %v461_v39 = vpop.eup %460  ;;  %v341_v40 = vmul.f32 %v388_v24, %v326_v37 }
 0x231   :  { %v463_v41 = vpop.eup %462  ;;  %v359_v43 = vadd.f32 %v389_v28, %v344_v38  ;;  %v330_v44 = vmul.f32 %v461_v39, %v568_v49 }
 0x232   :  { %v356_v45 = vadd.f32 %v389_v28, %v341_v40  ;;  %v327_v46 = vmul.f32 %v463_v41, %v574_v55 }
 0x233   :  { %367 = vst [vmem:[%s635_s5 + $0x18] sm:$0xff] %v359_v43  ;;  %v345_v42 = vmul.f32 %v388_v24, %v330_v44 }
 0x234   :  { %364 = vst [vmem:[%s635_s5] sm:$0xff] %v356_v45  ;;  %v342_v47 = vmul.f32 %v388_v24, %v327_v46 }
 0x235   :  { %v465_v48 = vpop.eup %464  ;;  %v360_v50 = vadd.f32 %v389_v28, %v345_v42 }
 0x236   :  { %v467_v51 = vpop.eup %466  ;;  %v357_v52 = vadd.f32 %v389_v28, %v342_v47  ;;  %v331_v53 = vmul.f32 %v465_v48, %v578_v59 }
 0x237   :  { %368 = vst [vmem:[%s635_s5 + $0x20] sm:$0xff] %v360_v50  ;;  %v332_v49 = vmul.f32 %v467_v51, %v582_v63 }
 0x238   :  { %365 = vst [vmem:[%s635_s5 + $0x8] sm:$0xff] %v357_v52  ;;  %v346_v54 = vmul.f32 %v388_v24, %v331_v53 }
 0x239   :  { %v469_v55 = vpop.eup %468  ;;  %v347_v56 = vmul.f32 %v388_v24, %v332_v49 }
 0x23a   :  { %v361_v57 = vadd.f32 %v389_v28, %v346_v54  ;;  %v333_v58 = vmul.f32 %v469_v55, %v584_v0 }
 0x23b   :  { %v362_v60 = vadd.f32 %v389_v28, %v347_v56 }
 0x23c   :  { %369 = vst [vmem:[%s635_s5 + $0x28] sm:$0xff] %v361_v57  ;;  %v348_v59 = vmul.f32 %v388_v24, %v333_v58 }
 0x23d   :  { %370 = vst [vmem:[%s635_s5 + $0x30] sm:$0xff] %v362_v60 }
 0x23e   :  { %v363_v61 = vadd.f32 %v389_v28, %v348_v59 }
 0x240   :  { %371 = vst [vmem:[%s635_s5 + $0x38] sm:$0xff] %v363_v61 }

// kernel: cuda_fast_weight_sum_linear_transformer_layer.2
= control target key start
LH: loop header
LB: loop body
LE: loop exit
PB: predicated region body
PF: predicated region fallthrough
CT: control target
= control target key end

     0   :  { %s1727_s9 = smov 0   ;;  %s1729_s10 = smov 0   ;;  %s2132_s0 = inlined_call_operand.vmem [shape: f32[2,32,128], index: 0, kind: input, shape index: {}]   ;;  %s2133_s1 = inlined_call_operand.vmem [shape: bf16[1,128,384], index: 1, kind: input, shape index: {}]   ;;  %s2134_s2 = inlined_call_operand.vmem [shape: bf16[2,32,128], index: 2, kind: output, shape index: {}]  }
   0x1   :  { %s1731_s11 = smov 0   ;;  %s1733_s12 = smov 0  }
   0x2   :  { %s1735_s13 = smov 0  }
   0x3 LB: > { %s24_s14 = sadd.s32 1, %s1696_s11  ;;  %s31_s15 = sadd.s32 1, %s1700_s12  ;;  %s1704_s13 = sphi %s1735_s13, %s12_s13   ;;  %s1700_s12 = sphi %s1733_s12, %s2138_s12   ;;  %s1696_s11 = sphi %s1731_s11, %s2137_s11   ;;  %s1692_s10 = sphi %s1729_s10, %s2136_s10   ;;  %s1688_s9 = sphi %s1727_s9, %s2135_s9  }
   0x4   : > { %p25_p0 = scmp.ge.s32.totalorder %s24_s14, 2  ;;  %p1366_p1 = scmp.ge.s32.totalorder %s1704_s13, 1 }
   0x5   : > { %p152_p2 = scmp.lt.s32.totalorder %s1704_s13, 5 }
   0x6   : > { %s2140_s14 = smov (%p25_p0, %s24_s14), 0  ;;  %s2142_s15 = smov (!%p25_p0, %s31_s15), %s1700_s12 }
   0x7   : > { %p153_p3 = pnand %p1366_p1, %p152_p2  ;;  %p33_p4 = scmp.ge.s32.totalorder %s2142_s15, 2 }
   0x8   : > { %s1367_s16 = sshll.u32 (!%p153_p3), %s1688_s9, 1  ;;  %p191_p5 = scmp.lt.s32.totalorder (!%p153_p3), %s1692_s10, 1 }
   0x9   : > { %s2144_s15 = smov (%p33_p4, %s2142_s15), 0  ;;  %156 = sbr.rel (%p153_p3) target bundleno = 1283 (0x503), region = 28 }
   0xa   : > { %p193_p6 = scmp.lt.s32.totalorder (!%p153_p3), %s1367_s16, 3  ;;  %p1373_p7 = scmp.ne.s32.totalorder (!%p153_p3), %s1688_s9, 0 }
  0x10   : > { %s2146_s10 = smov (!%p191_p5, %s1692_s10), 1  ;;  %s2148_s16 = smov (!%p193_p6, %s1367_s16), 3 }
  0x11   : > { %s1368_s17 = sshll.u32 %s2146_s10, 2  ;;  %222 = sbr.rel (%p1373_p7) target bundleno = 27 (0x1b), region = 32  ;;  %vm223_vm0 = vcmask (!%p1373_p7), 523264   ;;  %vm240_vm1 = vcmask (!%p1373_p7), 516096   ;;  %v1706_v0 = vmov (!%p1373_p7), 0.0  }
  0x12   : > { %s196_s18 = sadd.s32 %s1368_s17, %s2148_s16  ;;  %224 = vst.msk [vmem:[#allocation2] sm:$0xff] (!%p1373_p7), %vm223_vm0, %v1706_v0  ;;  %225 = vst.msk [vmem:[#allocation2 + $0x8] sm:$0xff] (!%p1373_p7), %vm223_vm0, %v1706_v0 }
  0x13   : > { %s1369_s19 = sshll.u32 %s196_s18, 3  ;;  %s1372_s20 = sshll.u32 %s196_s18, 2  ;;  %226 = vst.msk [vmem:[#allocation2 + $0x10] sm:$0xff] (!%p1373_p7), %vm223_vm0, %v1706_v0  ;;  %227 = vst.msk [vmem:[#allocation2 + $0x18] sm:$0xff] (!%p1373_p7), %vm223_vm0, %v1706_v0 }
  0x14   : > { %s1760_s23 = scalar_lea.vmem %s2132_s0, %s1369_s19  ;;  %s1765_s26 = scalar_lea.vmem %s2134_s2, %s1372_s20  ;;  %228 = vst.msk [vmem:[#allocation2 + $0x20] sm:$0xff] (!%p1373_p7), %vm223_vm0, %v1706_v0  ;;  %229 = vst.msk [vmem:[#allocation2 + $0x28] sm:$0xff] (!%p1373_p7), %vm223_vm0, %v1706_v0 }
  0x15   : > { %230 = vst.msk [vmem:[#allocation2 + $0x30] sm:$0xff] (!%p1373_p7), %vm223_vm0, %v1706_v0  ;;  %231 = vst.msk [vmem:[#allocation2 + $0x38] sm:$0xff] (!%p1373_p7), %vm223_vm0, %v1706_v0 }
  0x16   : > { %232 = vst.msk [vmem:[#allocation2 + $0x40] sm:$0xff] (!%p1373_p7), %vm223_vm0, %v1706_v0  ;;  %233 = vst.msk [vmem:[#allocation2 + $0x48] sm:$0xff] (!%p1373_p7), %vm223_vm0, %v1706_v0 }
  0x17   : > { %234 = vst.msk [vmem:[#allocation2 + $0x50] sm:$0xff] (!%p1373_p7), %vm223_vm0, %v1706_v0  ;;  %235 = vst.msk [vmem:[#allocation2 + $0x58] sm:$0xff] (!%p1373_p7), %vm223_vm0, %v1706_v0 }
  0x18   : > { %236 = vst.msk [vmem:[#allocation2 + $0x60] sm:$0xff] %vm223_vm0, %v1706_v0  ;;  %237 = vst.msk [vmem:[#allocation2 + $0x68] sm:$0xff] %vm223_vm0, %v1706_v0 }
  0x19   : > { %238 = vst.msk [vmem:[#allocation2 + $0x70] sm:$0xff] %vm223_vm0, %v1706_v0  ;;  %239 = vst.msk [vmem:[#allocation2 + $0x78] sm:$0xff] %vm223_vm0, %v1706_v0 }
  0x1a   : > { %241 = vst.msk [vmem:[#allocation3] sm:$0x1] %vm240_vm1, %v1706_v0  ;;  %242 = vst.msk [vmem:[#allocation3 + $0x1] sm:$0x1] %vm240_vm1, %v1706_v0 }
  0x1b PF: > { %v1602_v1 = vld [vmem:[%s2133_s1 + $0x4] ss:$12 sps:$4 sm:$0xff]   ;;  %v1604_v2 = vld [vmem:[%s2133_s1] ss:$12 sps:$4 sm:$0xff]   ;;  %v1707_v3 = vmov 0   ;;  %v1708_v22 = vmov 0.0  }
  0x1c   : > { %438 = vmatprep.mubr.bf16.mxu0 %v1707_v3  ;;  %406 = vmatprep.subr.bf16.mxu0 %v1602_v1  ;;  %v1605_v4 = vld [vmem:[%s2133_s1 + $0x1c] ss:$12 sps:$4 sm:$0xff]   ;;  %v1607_v5 = vld [vmem:[%s2133_s1 + $0x18] ss:$12 sps:$4 sm:$0xff]   ;;  %v1608_v6 = vld [vmem:[%s2133_s1 + $0x34] ss:$12 sps:$4 sm:$0xff]  }
  0x1d   : > { %407 = vmatpush1.bf16.msra.mxu0 %v1604_v2  ;;  %v1610_v7 = vld [vmem:[%s2133_s1 + $0x30] ss:$12 sps:$4 sm:$0xff]   ;;  %v1611_v8 = vld [vmem:[%s2133_s1 + $0x4c] ss:$12 sps:$4 sm:$0xff]   ;;  %v1613_v9 = vld [vmem:[%s2133_s1 + $0x48] ss:$12 sps:$4 sm:$0xff]   ;;  %1460 = vmatprep.subr.bf16.mxu1 %v1708_v22 }
  0x1e   : > { %408 = vmatprep.subr.bf16.mxu0 %v1605_v4  ;;  %v1614_v10 = vld [vmem:[%s2133_s1 + $0x64] ss:$12 sps:$4 sm:$0xff]   ;;  %v1616_v11 = vld [vmem:[%s2133_s1 + $0x60] ss:$12 sps:$4 sm:$0xff]   ;;  %v1617_v12 = vld [vmem:[%s2133_s1 + $0x7c] ss:$12 sps:$4 sm:$0xff]  }
  0x1f   : > { %v1619_v13 = vld [vmem:[%s2133_s1 + $0x78] ss:$12 sps:$4 sm:$0xff]   ;;  %v1620_v14 = vld [vmem:[%s2133_s1 + $0x94] ss:$12 sps:$4 sm:$0xff]   ;;  %v1622_v15 = vld [vmem:[%s2133_s1 + $0x90] ss:$12 sps:$4 sm:$0xff]  }
  0x20   : > { %v1623_v16 = vld [vmem:[%s2133_s1 + $0xac] ss:$12 sps:$4 sm:$0xff]   ;;  %v1625_v17 = vld [vmem:[%s2133_s1 + $0xa8] ss:$12 sps:$4 sm:$0xff]   ;;  %v243_v18 = vld [vmem:[%s1760_s23] sm:$0xff]  ;;  %vm1709_vm2 = vmmov 0  }
  0x21   : > { %409 = vmatpush1.bf16.msra.mxu0 %v1607_v5  ;;  %v244_v19 = vld [vmem:[%s1760_s23 + $0x8] sm:$0xff]  ;;  %1476 = vmatprep.mubr.msk.bf16.mxu1 %vm1709_vm2, %v1708_v22  ;;  %v1628_v24 = vld [vmem:[%s2133_s1 + $0x38] ss:$12 sps:$4 sm:$0xff]   ;;  %v1629_v25 = vld [vmem:[%s2133_s1 + $0x50] ss:$12 sps:$4 sm:$0xff]   ;;  %s1710_s4 = smov 64  }
  0x22   : > { %410 = vmatprep.subr.bf16.mxu0 %v1608_v6  ;;  %v245_v20 = vpack.c.bf16 %v244_v19, %v243_v18  ;;  %v1626_v21 = vld [vmem:[%s2133_s1 + $0x8] ss:$12 sps:$4 sm:$0xff]   ;;  %v1627_v23 = vld [vmem:[%s2133_s1 + $0x20] ss:$12 sps:$4 sm:$0xff]   ;;  %v1632_v28 = vld [vmem:[%s2133_s1 + $0x98] ss:$12 sps:$4 sm:$0xff]  }
  0x23   : > { %1461 = vmatpush3.bf16.msra.mxu1 %v1626_v21  ;;  %v1630_v26 = vld [vmem:[%s2133_s1 + $0x68] ss:$12 sps:$4 sm:$0xff]   ;;  %v1631_v27 = vld [vmem:[%s2133_s1 + $0x80] ss:$12 sps:$4 sm:$0xff]   ;;  %v1633_v29 = vld [vmem:[%s2133_s1 + $0xb0] ss:$12 sps:$4 sm:$0xff]  }
  0x24   : > { %1462 = vmatprep.subr.bf16.mxu1 %v1708_v22  ;;  %vm517_vm7 = vcmask 523264   ;;  %v1903_v62 = vld [vmem:[#allocation2] sm:$0xff]  ;;  %v1905_v63 = vld [vmem:[#allocation2 + $0x8] sm:$0xff]  ;;  %v1910_v1 = vld [vmem:[#allocation2 + $0x10] sm:$0xff]  ;;  %vm1089_vm8 = vcmask 1048064   ;;  %vm841_vm9 = vcmask 516096  }
  0x25   : > { %411 = vmatpush1.bf16.msra.mxu0 %v1610_v7  ;;  %v600_v0 = vpack.c.bf16 %v1905_v63, %v1903_v62  ;;  %v1912_v2 = vld [vmem:[#allocation2 + $0x18] sm:$0xff]  ;;  %v1917_v4 = vld [vmem:[#allocation2 + $0x20] sm:$0xff]  ;;  %v1919_v5 = vld [vmem:[#allocation2 + $0x28] sm:$0xff]  ;;  %vm645_vm10 = vcmask 130048  }
  0x26   : > { %412 = vmatprep.subr.bf16.mxu0 %v1611_v8  ;;  %v601_v3 = vpack.c.bf16 %v1912_v2, %v1910_v1  ;;  %v602_v7 = vpack.c.bf16 %v1919_v5, %v1917_v4 }
  0x27   : > { %1463 = vmatpush3.bf16.msra.mxu1 %v1627_v23 }
  0x28   : > { %1464 = vmatprep.subr.bf16.mxu1 %v1708_v22 }
  0x29   : > { %413 = vmatpush1.bf16.msra.mxu0 %v1613_v9 }
  0x2a   : > { %414 = vmatprep.subr.bf16.mxu0 %v1614_v10 }
  0x2b   : > { %1465 = vmatpush3.bf16.msra.mxu1 %v1628_v24 }
  0x2c   : > { %1466 = vmatprep.subr.bf16.mxu1 %v1708_v22 }
  0x2d   : > { %415 = vmatpush1.bf16.msra.mxu0 %v1616_v11  ;;  %v1926_v11 = vld [vmem:[#allocation2 + $0x30] sm:$0xff] }
  0x2e   : > { %416 = vmatprep.subr.bf16.mxu0 %v1617_v12  ;;  %v1928_v12 = vld [vmem:[#allocation2 + $0x38] sm:$0xff] }
  0x2f   : > { %1467 = vmatpush3.bf16.msra.mxu1 %v1629_v25 }
  0x30   : > { %1468 = vmatprep.subr.bf16.mxu1 %v1708_v22 }
  0x31   : > { %417 = vmatpush1.bf16.msra.mxu0 %v1619_v13 }
  0x32   : > { %418 = vmatprep.subr.bf16.mxu0 %v1620_v14  ;;  %v603_v14 = vpack.c.bf16 %v1928_v12, %v1926_v11 }
  0x33   : > { %1469 = vmatpush3.bf16.msra.mxu1 %v1630_v26 }
  0x34   : > { %1470 = vmatprep.subr.bf16.mxu1 %v1708_v22 }
  0x35   : > { %419 = vmatpush1.bf16.msra.mxu0 %v1622_v15 }
  0x36   : > { %420 = vmatprep.subr.bf16.mxu0 %v1623_v16 }
  0x37   : > { %1471 = vmatpush3.bf16.msra.mxu1 %v1631_v27 }
  0x38   : > { %1472 = vmatprep.subr.bf16.mxu1 %v1708_v22 }
  0x39   : > { %421 = vmatpush1.bf16.msra.mxu0 %v1625_v17 }
  0x3a   : > { %1480 = vmatprep.subr.bf16.mxu0 %v1708_v22 }
  0x3b   : > { %1473 = vmatpush3.bf16.msra.mxu1 %v1632_v28 }
  0x3c   : > { %439 = vmatmul.mubr.bf16.vlgmr.msra.gmra.mrb[0].mxu0 %v245_v20  ;;  %1474 = vmatprep.subr.bf16.mxu1 %v1708_v22 }
  0x3d   : > { %1482 = vmatprep.mubr.msk.bf16.mxu0 %vm1709_vm2, %v1708_v22 }
  0x3f   : > { %1475 = vmatpush3.bf16.msra.mxu1 %v1633_v29 }
  0x40   : > { %1486 = vmatprep.subr.bf16.mxu1 %v1708_v22 }
  0x42   : > { %1477 = vmatmul.mubr.bf16.vlgmr.msra.gmra.mrb[0].mxu1 %v245_v20  ;;  %v510_v20 = vlaneseq }
  0x43   : > { %1494 = vmatprep.mubr.msk.bf16.mxu1 %vm1709_vm2, %v1708_v22  ;;  %1487 = vmatpush3.bf16.msra.mxu1 %v600_v0 }
  0x44   : > { %1488 = vmatprep.subr.bf16.mxu1 %v1708_v22  ;;  %v1935_v26 = vshrl.u32 %v510_v20, 7 }
  0x47   : > { %1489 = vmatpush3.bf16.msra.mxu1 %v601_v3 }
  0x48   : > { %1490 = vmatprep.subr.bf16.mxu1 %v1708_v22 }
  0x4b   : > { %1491 = vmatpush3.bf16.msra.mxu1 %v602_v7 }
  0x4c   : > { %1492 = vmatprep.subr.bf16.mxu1 %v1708_v22 }
  0x4f   : > { %1493 = vmatpush3.bf16.msra.mxu1 %v603_v14 }
  0x50   : > { %1498 = vmatprep.subr.bf16.mxu1 %v1708_v22 }
 0x10f   : > { %v440_v30 = vpop.f32.mrb[0].mxu0 }
 0x110   : > { %v494_v31 = vmul.f32 1.442695, %v440_v30  ;;  %v442_v32 = vpop.f32.mrb[1].mxu0  ;;  %v492_v38 = vadd.f32 1.0, %v440_v30  ;;  %vm490_vm3 = vcmp.gt.f32.partialorder %v440_v30, 0.0 }
 0x111   : > { %v504_v33 = vmul.f32 1.442695, %v442_v32  ;;  %v444_v34 = vpop.f32.mrb[2].mxu0  ;;  %v502_v40 = vadd.f32 1.0, %v442_v32  ;;  %vm500_vm4 = vcmp.gt.f32.partialorder %v442_v32, 0.0 }
 0x112   : > { %1634 = vpow2.f32 %v494_v31  ;;  %v496_v35 = vmul.f32 1.442695, %v444_v34  ;;  %v446_v36 = vpop.f32.mrb[3].mxu0  ;;  %v493_v46 = vadd.f32 1.0, %v444_v34  ;;  %vm491_vm5 = vcmp.gt.f32.partialorder %v444_v34, 0.0 }
 0x113   : > { %1636 = vpow2.f32 %v504_v33  ;;  %v506_v37 = vmul.f32 1.442695, %v446_v36  ;;  %v503_v47 = vadd.f32 1.0, %v446_v36  ;;  %vm501_vm6 = vcmp.gt.f32.partialorder %v446_v36, 0.0 }
 0x114   : > { %1638 = vpow2.f32 %v496_v35  ;;  %v699_v34 = vsub.s32 0, %v1935_v26 }
 0x115   : > { %1640 = vpow2.f32 %v506_v37  ;;  %v483_v6 = vpop.f32.mrb[0].mxu1  ;;  %v549_v37 = vld [vmem:[#allocation3] sm:$0x1] }
 0x116   : > { %v1478_v8 = vpop.f32.mrb[1].mxu1 }
 0x117   : > { %v486_v9 = vpop.f32.mrb[2].mxu1 }
 0x118   : > { %v1923_v10 = vpack.c.bf16 %v486_v9, %v483_v6  ;;  %v1479_v13 = vpop.f32.mrb[3].mxu1 }
 0x11c   : > { %v1635_v39 = vpop.eup %1634 }
 0x11d   : > { %v1637_v41 = vpop.eup %1636  ;;  %v1875_v42 = vsel %vm490_vm3, %v492_v38, %v1635_v39 }
 0x11e   : > { %v1639_v43 = vpop.eup %1638  ;;  %845 = vrot.lane.b32.xlu1 %v1875_v42, %s1710_s4  ;;  %v1879_v44 = vsel %vm500_vm4, %v502_v40, %v1637_v41  ;;  %v518_v59 = vsel %vm517_vm7, %v1875_v42, 0.0  ;;  %v700_v41 = vrot.slane %v549_v37, %v699_v34 }
 0x11f   : > { %v1641_v45 = vpop.eup %1640  ;;  %863 = vrot.lane.b32.xlu0 %v1879_v44, %s1710_s4  ;;  %v1883_v48 = vsel %vm491_vm5, %v493_v46, %v1639_v43  ;;  %v528_v58 = vsel %vm517_vm7, %v1879_v44, 0.0 }
 0x120   : > { %v1887_v49 = vsel %vm501_vm6, %v503_v47, %v1641_v45  ;;  %v521_v61 = vsel %vm517_vm7, %v1883_v48, 0.0 }
 0x121   : > { %v531_v60 = vsel %vm517_vm7, %v1887_v49, 0.0 }
 0x122   : > { %847 = vrot.lane.b32.xlu1 %v1883_v48, %s1710_s4 }
 0x123   : > { %865 = vrot.lane.b32.xlu0 %v1887_v49, %s1710_s4 }
 0x190   : > { %v846_v50 = vpop.permute.xlu1 %845 }
 0x191   : > { %v864_v51 = vpop.permute.xlu0 %863  ;;  %v851_v54 = vsel %vm517_vm7, %v846_v50, 0.0 }
 0x192   : > { %v869_v52 = vsel %vm517_vm7, %v864_v51, 0.0 }
 0x193   : > { %870 = vadd.xlane.f32.xlu0 %v869_v52  ;;  %v1950_v52 = vld [vmem:[#allocation3 + $0x1] sm:$0x1] }
 0x194   : > { %v848_v56 = vpop.permute.xlu1 %847 }
 0x195   : > { %v866_v53 = vpop.permute.xlu0 %865  ;;  %v854_v57 = vsel %vm517_vm7, %v848_v56, 0.0 }
 0x196   : > { %v872_v55 = vsel %vm517_vm7, %v866_v53, 0.0 }
 0x197   : > { %852 = vadd.xlane.f32.xlu0 %v851_v54  ;;  %873 = vadd.xlane.f32.xlu1 %v872_v55 }
 0x19b   : > { %855 = vadd.xlane.f32.xlu0 %v854_v57  ;;  %529 = vadd.xlane.f32.xlu1 %v528_v58 }
 0x19f   : > { %519 = vadd.xlane.f32.xlu1 %v518_v59  ;;  %532 = vadd.xlane.f32.xlu0 %v531_v60 }
 0x1a3   : > { %522 = vadd.xlane.f32.xlu0 %v521_v61 }
 0x220   : > { %v871_v15 = vpop.xlane.xlu0 %870 }
 0x221   : > { %1642 = vrcp.f32 %v871_v15 }
 0x224   : > { %v874_v16 = vpop.xlane.xlu1 %873  ;;  %v853_v17 = vpop.xlane.xlu0 %852 }
 0x225   : > { %1644 = vrcp.f32 %v874_v16 }
 0x226   : > { %1646 = vrcp.f32 %v853_v17 }
 0x228   : > { %v530_v18 = vpop.xlane.xlu1 %529  ;;  %v856_v19 = vpop.xlane.xlu0 %855 }
 0x229   : > { %1648 = vrcp.f32 %v530_v18 }
 0x22a   : > { %1650 = vrcp.f32 %v856_v19 }
 0x22b   : > { %v1643_v21 = vpop.eup %1642 }
 0x22c   : > { %v520_v23 = vpop.xlane.xlu1 %519  ;;  %v533_v24 = vpop.xlane.xlu0 %532  ;;  %v876_v25 = vmul.f32 %v1643_v21, %v1879_v44 }
 0x22d   : > { %1652 = vrcp.f32 %v520_v23 }
 0x22e   : > { %1654 = vrcp.f32 %v533_v24  ;;  %v1202_v32 = vsel %vm1089_vm8, %v876_v25, 0.0 }
 0x22f   : > { %v1645_v27 = vpop.eup %1644 }
 0x230   : > { %v523_v28 = vpop.xlane.xlu0 %522  ;;  %v878_v29 = vmul.f32 %v1645_v27, %v1887_v49  ;;  %v1647_v30 = vpop.eup %1646  ;;  %v1994_v27 = vand.u32 127, %v510_v20 }
 0x231   : > { %1656 = vrcp.f32 %v523_v28  ;;  %v858_v39 = vmul.f32 %v1647_v30, %v1875_v42  ;;  %v1997_v28 = vadd.s32 8, %v1935_v26 }
 0x232   : > { %v880_v31 = vpack.c.bf16 %v878_v29, %v876_v25  ;;  %v1203_v33 = vsel %vm1089_vm8, %v878_v29, 0.0  ;;  %vm515_vm11 = vcmp.le.s32.totalorder %v1994_v27, %v1935_v26 }
 0x233   : > { %v1649_v35 = vpop.eup %1648  ;;  %v1941_v36 = vadd.f32 %v1203_v33, %v1202_v32  ;;  %vm516_vm12 = vcmp.le.s32.totalorder %v1994_v27, %v1997_v28  ;;  %v2006_v32 = vld [vmem:[#allocation2 + $0x48] sm:$0xff] }
 0x234   : > { %v1651_v38 = vpop.eup %1650  ;;  %896 = vrot.lane.b32.xlu1 %v880_v31, %s1710_s4  ;;  %v535_v46 = vmul.f32 %v1649_v35, %v1879_v44  ;;  %v2004_v31 = vld [vmem:[#allocation2 + $0x40] sm:$0xff] }
 0x235   : > { %v860_v40 = vmul.f32 %v1651_v38, %v1883_v48 }
 0x236   : > { %v831_v56 = vsel %vm517_vm7, %v535_v46, 0.0 }
 0x237   : > { %v1653_v43 = vpop.eup %1652  ;;  %v879_v45 = vpack.c.bf16 %v860_v40, %v858_v39 }
 0x238   : > { %v1655_v47 = vpop.eup %1654  ;;  %v525_v50 = vmul.f32 %v1653_v43, %v1875_v42  ;;  %v2025_v43 = vld [vmem:[#allocation2 + $0x58] sm:$0xff] }
 0x239   : > { %893 = vrot.lane.b32.xlu0 %v879_v45, %s1710_s4  ;;  %v537_v51 = vmul.f32 %v1655_v47, %v1887_v49  ;;  %v1051_v49 = vrot.slane %v1950_v52, %v699_v34  ;;  %v2035_v47 = vld [vmem:[#allocation2 + $0x68] sm:$0xff] }
 0x23a   : > { %v1952_v53 = vmul.f32 %v700_v41, %v525_v50 }
 0x23b   : > { %v1657_v54 = vpop.eup %1656  ;;  %v539_v55 = vpack.c.bf16 %v537_v51, %v535_v46  ;;  %v832_v57 = vsel %vm517_vm7, %v537_v51, 0.0  ;;  %v2033_v46 = vld [vmem:[#allocation2 + $0x60] sm:$0xff]  ;;  %v2040_v51 = vld [vmem:[#allocation2 + $0x70] sm:$0xff] }
 0x23c   : > { %v527_v58 = vmul.f32 %v1657_v54, %v1883_v48  ;;  %v833_v44 = vadd.f32 %v832_v57, %v831_v56  ;;  %v2042_v54 = vld [vmem:[#allocation2 + $0x78] sm:$0xff] }
 0x23d   : > { %994 = vrot.lane.b32.xlu0 %v1923_v10, %s1710_s4  ;;  %v554_v42 = vsel %vm517_vm7, %v539_v55, 0 }
 0x23e   : > { %1481 = vmatpush3.bf16.xpose.msra.mxu0 %v554_v42  ;;  %v834_v59 = vrot.slane %v833_v44, 4  ;;  %v538_v60 = vpack.c.bf16 %v527_v58, %v525_v50  ;;  %v1961_v61 = vmul.f32 %v700_v41, %v527_v58  ;;  %v2023_v41 = vld [vmem:[#allocation2 + $0x50] sm:$0xff]  ;;  %v950_v50 = vpack.c.bf16 %v2035_v47, %v2033_v46 }
 0x23f   : > { %1504 = vmatprep.subr.bf16.mxu0 %v1923_v10  ;;  %v949_v45 = vpack.c.bf16 %v2025_v43, %v2023_v41 }
 0x240   : > { %v835_v0 = vadd.f32 %v834_v59, %v833_v44  ;;  %1495 = vmatmul.mubr.msk.bf16.vlgmr.msra.gmra.mrb[4].mxu1 %vm517_vm7, %v538_v60 }
 0x241   : > { %1052 = vrot.lane.b32.xlu0 %v1051_v49, %s1710_s4  ;;  %1499 = vmatpush3.bf16.msra.mxu1 %v1923_v10 }
 0x242   : > { %v836_v48 = vrot.slane %v835_v0, 2  ;;  %1500 = vmatprep.mubr.msk.bf16.mxu1 %vm1709_vm2, %v1708_v22  ;;  %1520 = vmatprep.subr.bf16.mxu1 %v1708_v22 }
 0x244   : > { %v837_v3 = vadd.f32 %v836_v48, %v835_v0 }
 0x245   : > { %1483 = vmatmul.mubr.msk.bf16.vlgmr.msra.gmra.mrb[4].mxu0 %vm517_vm7, %v538_v60 }
 0x246   : > { %1505 = vmatpush3.bf16.msra.mxu0 %v1923_v10  ;;  %v838_v6 = vrot.slane %v837_v3, 1 }
 0x247   : > { %1514 = vmatprep.subr.bf16.mxu0 %v1708_v22 }
 0x248   : > { %v839_v7 = vadd.f32 %v838_v6, %v837_v3 }
 0x24a   : > { %v840_v8 = vadd.f32 %v839_v7, %v549_v37 }
 0x24c   : > { %842 = vst.msk [vmem:[#allocation3] sm:$0x1] %vm841_vm9, %v840_v8 }
 0x257   : > { %722 = vxpose.xlu1.c.b16.start.end [1/1] (short) (narrow) %v539_v55, 64  ;;  %v951_v55 = vpack.c.bf16 %v2042_v54, %v2040_v51 }
 0x2a6   : > { %v897_v9 = vpop.permute.xlu1 %896 }
 0x2a7   : > { %1093 = vxpose.xlu0.c.b16.start.end [1/1] (short) (narrow) %v897_v9, 64  ;;  %v902_v19 = vsel %vm517_vm7, %v897_v9, 0 }
 0x2ab   : > { %v1974_v13 = vpop.permute.xlu0 %893 }
 0x2af   : > { %v1976_v14 = vpop.permute.xlu0 %994 }
 0x2b3   : > { %v1053_v15 = vpop.permute.xlu0 %1052 }
 0x2b4   : > { %v1055_v16 = vmul.f32 %v1053_v15, %v858_v39  ;;  %v1056_v10 = vmul.f32 %v1053_v15, %v860_v40  ;;  %v948_v39 = vpack.c.bf16 %v2006_v32, %v2004_v31 }
 0x2b6   : > { %1059 = vrot.lane.b32.xlu1 %v1055_v16, %s1710_s4 }
 0x2bc   : > { %1061 = vrot.lane.b32.xlu0 %v1056_v10, %s1710_s4 }
 0x2bd   : > { %v730_v17 = vpop.trf.xlu1 }
 0x2be   : > { %1506 = vmatprep.mubr.msk.bf16.mxu0 %vm645_vm10, %v730_v17 }
 0x2c1   : > { %v731_v18 = vpop.trf.xlu1 }
 0x2c2   : > { %1507 = vmatmul.mubr.msk.bf16.vlgmr.msra.gmra.mrb[8].mxu0 %vm645_vm10, %v731_v18  ;;  %v707_v18 = vsel %vm517_vm7, %v1961_v61, 0.0 }
 0x2c3   : > { %1515 = vmatpush3.bf16.xpose.msra.mxu0 %v902_v19 }
 0x2c4   : > { %1538 = vmatprep.subr.bf16.mxu0 %v1976_v14 }
 0x2c5   : > { %v732_v21 = vpop.trf.xlu1 }
 0x2c6   : > { %1510 = vmatprep.mubr.msk.bf16.mxu0 %vm645_vm10, %v732_v21  ;;  %v704_v21 = vsel %vm517_vm7, %v1952_v53, 0.0 }
 0x2c9   : > { %v733_v23 = vpop.trf.xlu1 }
 0x2ca   : > { %1511 = vmatmul.mubr.msk.bf16.gmra.mrb[12].mxu0 %vm645_vm10, %v733_v23 }
 0x2cb   : > { %1516 = vmatprep.mubr.msk.bf16.mxu0 %vm1709_vm2, %v1708_v22 }
 0x2d2   : > { %1517 = vmatmul.mubr.msk.bf16.vlgmr.msra.gmra.mrb[16].mxu0 %vm517_vm7, %v1974_v13 }
 0x2d3   : > { %1539 = vmatpush3.bf16.msra.mxu0 %v1976_v14 }
 0x30d   : > { %v1101_v24 = vpop.trf.xlu0 }
 0x30e   : > { %1540 = vmatprep.mubr.msk.bf16.mxu0 %vm645_vm10, %v1101_v24 }
 0x311   : > { %v1102_v25 = vpop.trf.xlu0 }
 0x312   : > { %1541 = vmatmul.mubr.msk.bf16.vlgmr.msra.gmra.mrb[20].mxu0 %vm645_vm10, %v1102_v25 }
 0x315   : > { %v1103_v29 = vpop.trf.xlu0 }
 0x316   : > { %1544 = vmatprep.mubr.msk.bf16.mxu0 %vm645_vm10, %v1103_v29 }
 0x318   : > { %v590_v30 = vpop.f32.mrb[4].mxu0 }
 0x319   : > { %v1484_v33 = vpop.f32.mrb[5].mxu0  ;;  %v1104_v20 = vpop.trf.xlu0  ;;  %v2012_v35 = vsel %vm515_vm11, %v590_v30, 0.0 }
 0x31a   : > { %v593_v34 = vpop.f32.mrb[6].mxu0  ;;  %1545 = vmatmul.mubr.msk.bf16.gmra.mrb[24].mxu0 %vm645_vm10, %v1104_v20  ;;  %v690_v19 = vsel %vm645_vm10, %v2012_v35, 0.0 }
 0x31b   : > { %v2017_v37 = vsel %vm516_vm12, %v593_v34, 0.0  ;;  %v1485_v38 = vpop.f32.mrb[7].mxu0 }
 0x31c   : > { %v599_v40 = vpack.c.bf16 %v2017_v37, %v2012_v35  ;;  %v693_v10 = vsel %vm645_vm10, %v2017_v37, 0.0 }
 0x31e   : > { %1501 = vmatmul.mubr.msk.bf16.vlgmr.msra.gmra.mrb[4].mxu1 %vm645_vm10, %v599_v40 }
 0x31f   : > { %1521 = vmatpush3.bf16.msra.mxu1 %v948_v39  ;;  %1528 = vmatprep.mubr.msk.bf16.mxu1 %vm1709_vm2, %v1708_v22 }
 0x320   : > { %1522 = vmatprep.subr.bf16.mxu1 %v1708_v22 }
 0x323   : > { %1523 = vmatpush3.bf16.msra.mxu1 %v949_v45 }
 0x324   : > { %1524 = vmatprep.subr.bf16.mxu1 %v1708_v22 }
 0x327   : > { %1525 = vmatpush3.bf16.msra.mxu1 %v950_v50 }
 0x328   : > { %1526 = vmatprep.subr.bf16.mxu1 %v1708_v22  ;;  %v1060_v9 = vpop.permute.xlu1 %1059 }
 0x329   : > { %v1065_v15 = vsel %vm517_vm7, %v1060_v9, 0.0 }
 0x32b   : > { %1527 = vmatpush3.bf16.msra.mxu1 %v951_v55 }
 0x32c   : > { %1532 = vmatprep.subr.bf16.mxu1 %v1708_v22 }
 0x32e   : > { %1529 = vmatmul.mubr.msk.bf16.vlgmr.msra.gmra.mrb[8].mxu1 %vm517_vm7, %v1974_v13  ;;  %v1062_v16 = vpop.permute.xlu0 %1061 }
 0x32f   : > { %1533 = vmatpush3.bf16.msra.mxu1 %v1976_v14  ;;  %1534 = vmatprep.mubr.msk.bf16.mxu1 %vm1709_vm2, %v1708_v22  ;;  %v1068_v17 = vsel %vm517_vm7, %v1062_v16, 0.0 }
 0x395   : > { %v1508_v56 = vpop.f32.mrb[8].mxu0 }
 0x396   : > { %v817_v57 = vadd.f32 %v1508_v56, %v1910_v1  ;;  %v784_v58 = vpop.f32.mrb[9].mxu0 }
 0x397   : > { %v815_v44 = vadd.f32 %v784_v58, %v1903_v62  ;;  %v1509_v42 = vpop.f32.mrb[10].mxu0 }
 0x398   : > { %825 = vst.msk [vmem:[#allocation2 + $0x10] sm:$0xff] %vm517_vm7, %v817_v57  ;;  %v818_v49 = vadd.f32 %v1509_v42, %v1912_v2  ;;  %v787_v59 = vpop.f32.mrb[11].mxu0 }
 0x399   : > { %823 = vst.msk [vmem:[#allocation2] sm:$0xff] %vm517_vm7, %v815_v44  ;;  %v816_v60 = vadd.f32 %v787_v59, %v1905_v63 }
 0x39a   : > { %826 = vst.msk [vmem:[#allocation2 + $0x18] sm:$0xff] %vm517_vm7, %v818_v49 }
 0x39b   : > { %824 = vst.msk [vmem:[#allocation2 + $0x8] sm:$0xff] %vm517_vm7, %v816_v60 }
 0x39d   : > { %v1512_v22 = vpop.f32.mrb[12].mxu0 }
 0x39e   : > { %v821_v1 = vadd.f32 %v1512_v22, %v1926_v11  ;;  %v800_v0 = vpop.f32.mrb[13].mxu0 }
 0x39f   : > { %v819_v62 = vadd.f32 %v800_v0, %v1917_v4  ;;  %v1513_v48 = vpop.f32.mrb[14].mxu0  ;;  %v1205_v0 = vrot.slane %v1941_v36, 4 }
 0x3a0   : > { %829 = vst.msk [vmem:[#allocation2 + $0x30] sm:$0xff] %vm517_vm7, %v821_v1  ;;  %v822_v2 = vadd.f32 %v1513_v48, %v1928_v12  ;;  %v803_v3 = vpop.f32.mrb[15].mxu0 }
 0x3a1   : > { %827 = vst.msk [vmem:[#allocation2 + $0x20] sm:$0xff] %vm517_vm7, %v819_v62  ;;  %v820_v63 = vadd.f32 %v803_v3, %v1919_v5  ;;  %v1206_v62 = vadd.f32 %v1205_v0, %v1941_v36 }
 0x3a2   : > { %830 = vst.msk [vmem:[#allocation2 + $0x38] sm:$0xff] %vm517_vm7, %v822_v2 }
 0x3a3   : > { %828 = vst.msk [vmem:[#allocation2 + $0x28] sm:$0xff] %vm517_vm7, %v820_v63  ;;  %v1207_v3 = vrot.slane %v1206_v62, 2 }
 0x3a5   : > { %v938_v6 = vpop.f32.mrb[16].mxu0 }
 0x3a6   : > { %v945_v11 = vsel %vm515_vm11, %v938_v6, 0.0  ;;  %v1518_v4 = vpop.f32.mrb[17].mxu0 }
 0x3a7   : > { %v941_v7 = vpop.f32.mrb[18].mxu0  ;;  %v1041_v8 = vsel %vm645_vm10, %v945_v11, 0.0  ;;  %v1711_v4 = vmov 1966171168  }
 0x3a8   : > { %v946_v12 = vsel %vm516_vm12, %v941_v7, 0.0  ;;  %v1519_v13 = vpop.f32.mrb[19].mxu0  ;;  %1042 = vadd.xlane.f32.xlu1 %v1041_v8  ;;  %v1213_v7 = vunpack.c.l.s4 %v1711_v4 }
 0x3a9   : > { %v947_v5 = vpack.c.bf16 %v946_v12, %v945_v11  ;;  %v1044_v14 = vsel %vm645_vm10, %v946_v12, 0.0  ;;  %v1208_v11 = vadd.f32 %v1207_v3, %v1206_v62 }
 0x3aa   : > { %1045 = vadd.xlane.f32.xlu0 %v1044_v14  ;;  %v1214_v9 = vunpack.c.0.s8 %v1213_v7 }
 0x3ab   : > { %1535 = vmatmul.mubr.msk.bf16.vlgmr.msra.gmra.mrb[8].mxu1 %vm645_vm10, %v947_v5  ;;  %v1209_v8 = vrot.slane %v1208_v11, 1 }
 0x3ac   : > { %1066 = vadd.xlane.f32.xlu1 %v1065_v15  ;;  %v1217_v13 = vsub.s32 %v1214_v9, %v1935_v26 }
 0x3ad   : > { %v1210_v12 = vadd.f32 %v1209_v8, %v1208_v11 }
 0x3ae   : > { %694 = vadd.xlane.f32.xlu0 %v693_v10 }
 0x3b0   : > { %1069 = vadd.xlane.f32.xlu1 %v1068_v17 }
 0x3b2   : > { %708 = vadd.xlane.f32.xlu0 %v707_v18 }
 0x3b4   : > { %691 = vadd.xlane.f32.xlu1 %v690_v19  ;;  %v1218_v19 = vrot.slane %v1210_v12, %v1217_v13 }
 0x3b8   : > { %705 = vadd.xlane.f32.xlu1 %v704_v21 }
 0x3e5   : > { %v1542_v28 = vpop.f32.mrb[20].mxu0 }
 0x3e6   : > { %v1188_v29 = vadd.f32 %v1542_v28, %v2023_v41  ;;  %v1155_v30 = vpop.f32.mrb[21].mxu0 }
 0x3e7   : > { %v1186_v33 = vadd.f32 %v1155_v30, %v2004_v31  ;;  %v1543_v61 = vpop.f32.mrb[22].mxu0 }
 0x3e8   : > { %1196 = vst.msk [vmem:[#allocation2 + $0x50] sm:$0xff] %vm517_vm7, %v1188_v29  ;;  %v1189_v20 = vadd.f32 %v1543_v61, %v2025_v43  ;;  %v1158_v34 = vpop.f32.mrb[23].mxu0 }
 0x3e9   : > { %1194 = vst.msk [vmem:[#allocation2 + $0x40] sm:$0xff] %vm517_vm7, %v1186_v33  ;;  %v1187_v53 = vadd.f32 %v1158_v34, %v2006_v32 }
 0x3ea   : > { %1197 = vst.msk [vmem:[#allocation2 + $0x58] sm:$0xff] %vm517_vm7, %v1189_v20 }
 0x3eb   : > { %1195 = vst.msk [vmem:[#allocation2 + $0x48] sm:$0xff] %vm517_vm7, %v1187_v53 }
 0x3ed   : > { %v1546_v35 = vpop.f32.mrb[24].mxu0 }
 0x3ee   : > { %v1192_v37 = vadd.f32 %v1546_v35, %v2040_v51  ;;  %v1171_v38 = vpop.f32.mrb[25].mxu0 }
 0x3ef   : > { %v1190_v31 = vadd.f32 %v1171_v38, %v2033_v46  ;;  %v1547_v39 = vpop.f32.mrb[26].mxu0 }
 0x3f0   : > { %1200 = vst.msk [vmem:[#allocation2 + $0x70] sm:$0xff] %vm517_vm7, %v1192_v37  ;;  %v1193_v40 = vadd.f32 %v1547_v39, %v2042_v54  ;;  %v1174_v41 = vpop.f32.mrb[27].mxu0 }
 0x3f1   : > { %v683_v23 = vpop.f32.mrb[4].mxu1  ;;  %1198 = vst.msk [vmem:[#allocation2 + $0x60] sm:$0xff] %vm517_vm7, %v1190_v31  ;;  %v1191_v32 = vadd.f32 %v1174_v41, %v2035_v47 }
 0x3f2   : > { %v1502_v24 = vpop.f32.mrb[5].mxu1  ;;  %1201 = vst.msk [vmem:[#allocation2 + $0x78] sm:$0xff] %vm517_vm7, %v1193_v40  ;;  %v712_v60 = vmul.f32 0.125, %v683_v23 }
 0x3f3   : > { %v686_v25 = vpop.f32.mrb[6].mxu1  ;;  %1199 = vst.msk [vmem:[#allocation2 + $0x68] sm:$0xff] %vm517_vm7, %v1191_v32  ;;  %v1225_v24 = vrot.slane %v1218_v19, %v1217_v13 }
 0x3f4   : > { %v1503_v27 = vpop.f32.mrb[7].mxu1  ;;  %v713_v49 = vmul.f32 0.125, %v686_v25 }
 0x435   : > { %v1043_v43 = vpop.xlane.xlu1 %1042 }
 0x437   : > { %v1046_v45 = vpop.xlane.xlu0 %1045 }
 0x439   : > { %v1067_v50 = vpop.xlane.xlu1 %1066 }
 0x43a   : > { %v1071_v48 = vadd.f32 %v1067_v50, %v1043_v43 }
 0x43b   : > { %v695_v51 = vpop.xlane.xlu0 %694 }
 0x43c   : > { %v1075_v63 = vadd.f32 1e-05, %v1071_v48 }
 0x43d   : > { %v1070_v55 = vpop.xlane.xlu1 %1069 }
 0x43e   : > { %v1072_v2 = vadd.f32 %v1070_v55, %v1046_v45 }
 0x43f   : > { %v709_v46 = vpop.xlane.xlu0 %708 }
 0x440   : > { %v711_v56 = vadd.f32 %v709_v46, %v695_v51  ;;  %v1076_v6 = vadd.f32 1e-05, %v1072_v2 }
 0x441   : > { %v692_v57 = vpop.xlane.xlu1 %691 }
 0x442   : > { %v715_v58 = vadd.f32 1e-05, %v711_v56 }
 0x444   : > { %1658 = vrcp.f32 %v715_v58 }
 0x445   : > { %v706_v54 = vpop.xlane.xlu1 %705 }
 0x446   : > { %v710_v44 = vadd.f32 %v706_v54, %v692_v57 }
 0x448   : > { %v714_v42 = vadd.f32 1e-05, %v710_v44 }
 0x44a   : > { %1660 = vrcp.f32 %v714_v42 }
 0x44b   : > { %1662 = vrcp.f32 %v1075_v63 }
 0x44c   : > { %1664 = vrcp.f32 %v1076_v6 }
 0x44e   : > { %v1659_v47 = vpop.eup %1658 }
 0x44f   : > { %v719_v59 = vmul.f32 %v1659_v47, %v713_v49 }
 0x451   : > { %721 = vst.msk [vmem:[#allocation4 + $0x8] sm:$0xff] %vm517_vm7, %v719_v59 }
 0x454   : > { %v1661_v22 = vpop.eup %1660 }
 0x455   : > { %v717_v1 = vmul.f32 %v1661_v22, %v712_v60  ;;  %v1663_v16 = vpop.eup %1662 }
 0x456   : > { %v1665_v21 = vpop.eup %1664 }
 0x457   : > { %720 = vst.msk [vmem:[#allocation4] sm:$0xff] %vm517_vm7, %v717_v1 }
 0x47e   : > { %v1034_v5 = vpop.f32.mrb[8].mxu1 }
 0x47f   : > { %v1073_v14 = vmul.f32 0.125, %v1034_v5  ;;  %v1536_v15 = vpop.f32.mrb[9].mxu1 }
 0x480   : > { %v1037_v36 = vpop.f32.mrb[10].mxu1 }
 0x481   : > { %v1078_v10 = vmul.f32 %v1663_v16, %v1073_v14  ;;  %v1074_v17 = vmul.f32 0.125, %v1037_v36  ;;  %v1537_v18 = vpop.f32.mrb[11].mxu1 }
 0x483   : > { %v1080_v23 = vmul.f32 %v1665_v21, %v1074_v17  ;;  %1083 = vrot.lane.b32.xlu1 %v1078_v10, %s1710_s4 }
 0x485   : > { %1085 = vrot.lane.b32.xlu0 %v1080_v23, %s1710_s4 }
 0x487   : > { %1226 = vrot.lane.b32.xlu1 %v1225_v24, %s1710_s4 }
 0x4f5   : > { %v1084_v26 = vpop.permute.xlu1 %1083 }
 0x4f6   : > { %1090 = vst.msk [vmem:[#allocation4] sm:$0xff] %vm1089_vm8, %v1084_v26 }
 0x4f7   : > { %v1086_v25 = vpop.permute.xlu0 %1085 }
 0x4f8   : > { %1091 = vst.msk [vmem:[#allocation4 + $0x8] sm:$0xff] %vm1089_vm8, %v1086_v25 }
 0x4f9   : > { %v1227_v27 = vpop.permute.xlu1 %1226 }
 0x4fa   : > { %v1229_v28 = vadd.f32 %v1227_v27, %v1950_v52 }
 0x4fc   : > { %1230 = vst.msk [vmem:[#allocation3 + $0x1] sm:$0x1] %vm841_vm9, %v1229_v28 }
 0x4fd   : > { %v1231_v29 = vld [vmem:[#allocation4] sm:$0xff] }
 0x4ff   : > { %v1232_v30 = vld [vmem:[#allocation4 + $0x8] sm:$0xff] }
 0x500   : > { %v1421_v33 = vpack.c.bf16 %v1232_v30, %v1231_v29 }
 0x502   : > { %1422 = vst [vmem:[%s1765_s26] sm:$0xff] %v1421_v33  }
 0x503 PF: > { %s12_s13 = sadd.s32 1, %s1704_s13   ;;  %s2135_s9 = smov %s1696_s11 }
 0x504   : > { %p9_p8 = scmp.ge.s32.totalorder %s12_s13, 6   ;;  %s2136_s10 = smov %s1700_s12 }
 0x505   : > { %s2137_s11 = smov %s2140_s14  ;;  %s2138_s12 = smov %s2144_s15 }
 0x506   :  { %11 = sbr.rel (!%p9_p8) target bundleno = 3 (0x3), region = 67 }

</bundles_post_ra>
